<compile_context>
chip_gen: v7x
topology: tpu7x:2x2x1
jax: 0.10.0
libtpu: 0.0.40
codegen_flags: <defaults>
</compile_context>

<pallas_src>
import numpy as np

import jax
import jax.numpy as jnp
from jax.experimental import pallas as pl
from jax.experimental.pallas import tpu as pltpu


# ----------------------------------------------------------------------------
# Kernel 1/2: fused valid-conv (stride 1) + bias + ReLU + 2x2 max-pool
# ----------------------------------------------------------------------------
def _conv_relu_pool_kernel(x_ref, wrow_ref, b_ref, se_ref, so_ref,
                           re_ref, ro_ref, o_ref):
    """One image per program.

    x_ref    : (H, W*Cin)            NHWC image, (W, Cin) packed into lanes
    wrow_ref : (KH, W*Cin, Wo*Cout)  Toeplitz row-weights (one 2-D dot per kh tap)
    b_ref    : (1, Wo*Cout)          bias tiled across output width
    se/so    : (Wo*Cout, Wp*Cout)    0/1 selectors of even/odd output columns
    re/ro    : (Hp, Ho)              0/1 selectors of even/odd output rows
    o_ref    : (Hp, Wp*Cout)         pooled output slab
    """
    kh = wrow_ref.shape[0]
    ho = x_ref.shape[0] - kh + 1
    woc = wrow_ref.shape[2]

    # in-kernel "im2col": KH shifted row-matmuls accumulated in f32 (MXU)
    acc = jnp.zeros((ho, woc), jnp.float32)
    for i in range(kh):                                   # static unroll (5)
        acc = acc + jnp.dot(x_ref[pl.ds(i, ho), :], wrow_ref[i],
                            preferred_element_type=jnp.float32)
    acc = jnp.maximum(acc + b_ref[...], 0.0)              # bias + ReLU

    # 2x2 max-pool: width halving then height halving via 0/1 selection dots
    m1 = jnp.maximum(
        jnp.dot(acc, se_ref[...], preferred_element_type=jnp.float32),
        jnp.dot(acc, so_ref[...], preferred_element_type=jnp.float32))
    pooled = jnp.maximum(
        jnp.dot(re_ref[...], m1, preferred_element_type=jnp.float32),
        jnp.dot(ro_ref[...], m1, preferred_element_type=jnp.float32))
    o_ref[...] = pooled.astype(o_ref.dtype)


def conv_relu_pool(x, prep):
    """x: (B, H, W*Cin) NHWC with (W, Cin) packed; returns (B, Hp, Wp*Cout)."""
    wrow, bt, se, so, re, ro = prep
    B, H, WC = x.shape
    KH, _, WoC = wrow.shape
    Hp, Ho = re.shape
    WpC = se.shape[1]
    return pl.pallas_call(
        _conv_relu_pool_kernel,
        out_shape=jax.ShapeDtypeStruct((B, Hp, WpC), x.dtype),
        grid=(B,),
        in_specs=[
            pl.BlockSpec((None, H, WC), lambda b: (b, 0, 0)),   # one image / program
            pl.BlockSpec((KH, WC, WoC), lambda b: (0, 0, 0)),   # resident weights
            pl.BlockSpec((1, WoC), lambda b: (0, 0)),
            pl.BlockSpec((WoC, WpC), lambda b: (0, 0)),
            pl.BlockSpec((WoC, WpC), lambda b: (0, 0)),
            pl.BlockSpec((Hp, Ho), lambda b: (0, 0)),
            pl.BlockSpec((Hp, Ho), lambda b: (0, 0)),
        ],
        out_specs=pl.BlockSpec((None, Hp, WpC), lambda b: (b, 0, 0)),
        compiler_params=pltpu.CompilerParams(dimension_semantics=("parallel",)),
    )(x, wrow, bt, se, so, re, ro)


# ----------------------------------------------------------------------------
# Kernel 3: fused fc1 -> ReLU -> fc2 -> ReLU -> fc3 (logits padded to 128 lanes)
# ----------------------------------------------------------------------------
def _fc_chain_kernel(x_ref, w1_ref, b1_ref, w2_ref, b2_ref, w3_ref, b3_ref, o_ref):
    h = jnp.dot(x_ref[...], w1_ref[...], preferred_element_type=jnp.float32)
    h = jnp.maximum(h + b1_ref[...], 0.0)
    h = jnp.dot(h, w2_ref[...], preferred_element_type=jnp.float32)
    h = jnp.maximum(h + b2_ref[...], 0.0)
    o = jnp.dot(h, w3_ref[...], preferred_element_type=jnp.float32) + b3_ref[...]
    o_ref[...] = o.astype(o_ref.dtype)


def _fc_batch_block(B):
    for d in (256, 128, 64, 32, 16, 8):
        if B % d == 0:
            return d
    return B        # tiny batches: single full block (still satisfies (8,128) rule)


def fc_chain(x, w1, b1, w2, b2, w3, b3):
    B, K = x.shape
    Np = w3.shape[1]
    bm = _fc_batch_block(B)
    return pl.pallas_call(
        _fc_chain_kernel,
        out_shape=jax.ShapeDtypeStruct((B, Np), x.dtype),
        grid=(B // bm,),
        in_specs=[
            pl.BlockSpec((bm, K), lambda i: (i, 0)),
            pl.BlockSpec(w1.shape, lambda i: (0, 0)),
            pl.BlockSpec(b1.shape, lambda i: (0, 0)),
            pl.BlockSpec(w2.shape, lambda i: (0, 0)),
            pl.BlockSpec(b2.shape, lambda i: (0, 0)),
            pl.BlockSpec(w3.shape, lambda i: (0, 0)),
            pl.BlockSpec(b3.shape, lambda i: (0, 0)),
        ],
        out_specs=pl.BlockSpec((bm, Np), lambda i: (i, 0)),
        compiler_params=pltpu.CompilerParams(dimension_semantics=("parallel",)),
    )(x, w1, b1, w2, b2, w3, b3)


# ----------------------------------------------------------------------------
# One-time weight preprocessing (offline, numpy): layout conversion, Toeplitz
# row-weights, bias tiling, pool selectors, fc1 row permutation, fc3 padding.
# ----------------------------------------------------------------------------
def _conv_prep(w_pt, b, h_in, w_in):
    """PyTorch conv weight (Cout, Cin, KH, KW) + bias -> kernel constants."""
    w = np.transpose(np.asarray(w_pt, np.float32), (2, 3, 1, 0))   # (KH,KW,Cin,Cout)
    kh, kw, cin, cout = w.shape
    ho, wo = h_in - kh + 1, w_in - kw + 1
    hp, wp = ho // 2, wo // 2

    # Toeplitz row-weights:  out[ho, wo*Cout+d] = sum_i x_row[ho+i] @ wrow[i]
    wrow = np.zeros((kh, w_in * cin, wo * cout), np.float32)
    wflat = w.reshape(kh, kw * cin, cout)                          # (kw, cin) packed
    for i in range(kh):
        for o in range(wo):
            wrow[i, o * cin:o * cin + kw * cin, o * cout:(o + 1) * cout] = wflat[i]

    bt = np.tile(np.asarray(b, np.float32), wo).reshape(1, wo * cout)

    # 0/1 selectors implementing the 2x2 max-pool as MXU dots
    se = np.zeros((wo * cout, wp * cout), np.float32)
    so = np.zeros((wo * cout, wp * cout), np.float32)
    for p in range(wp):
        for d in range(cout):
            se[(2 * p) * cout + d, p * cout + d] = 1.0
            so[(2 * p + 1) * cout + d, p * cout + d] = 1.0
    re = np.zeros((hp, ho), np.float32)
    ro = np.zeros((hp, ho), np.float32)
    for p in range(hp):
        re[p, 2 * p] = 1.0
        ro[p, 2 * p + 1] = 1.0
    return tuple(jnp.asarray(a) for a in (wrow, bt, se, so, re, ro))


def prepare_params(p):
    prep = {}
    prep["conv1"] = _conv_prep(p["conv1_w"], p["conv1_b"], 32, 32)
    prep["conv2"] = _conv_prep(p["conv2_w"], p["conv2_b"], 14, 14)

    # fc1: PyTorch flattens NCHW (c, h, w); our pooled activation is flattened
    # NHWC (h, w, c). Permute weight rows once here instead of transposing the
    # activation on every forward pass.
    w1 = np.asarray(p["fc1_w"], np.float32)                        # (400, 120)
    w1 = w1.reshape(16, 5, 5, 120).transpose(1, 2, 0, 3).reshape(400, 120)
    prep["fc1_w"] = jnp.asarray(w1)
    prep["fc1_b"] = jnp.asarray(np.asarray(p["fc1_b"], np.float32).reshape(1, 120))
    prep["fc2_w"] = jnp.asarray(np.asarray(p["fc2_w"], np.float32))
    prep["fc2_b"] = jnp.asarray(np.asarray(p["fc2_b"], np.float32).reshape(1, 84))

    # Pad fc3 to 128 output lanes so the final store is lane-dense; real logits
    # are out[:, :10].
    w3 = np.zeros((84, 128), np.float32)
    w3[:, :10] = np.asarray(p["fc3_w"], np.float32)
    b3 = np.zeros((1, 128), np.float32)
    b3[0, :10] = np.asarray(p["fc3_b"], np.float32)
    prep["fc3_w"] = jnp.asarray(w3)
    prep["fc3_b"] = jnp.asarray(b3)
    return prep


# ----------------------------------------------------------------------------
# Deterministic PyTorch-style init (uniform(-1/sqrt(fan_in), 1/sqrt(fan_in)))
# ----------------------------------------------------------------------------
def init_params(key):
    def uniform(k, shape, fan_in):
        bound = 1.0 / float(fan_in) ** 0.5
        return jax.random.uniform(k, shape, jnp.float32, -bound, bound)

    ks = jax.random.split(key, 10)
    return {
        # conv weights in PyTorch layout (Cout, Cin, KH, KW)
        "conv1_w": uniform(ks[0], (6, 3, 5, 5), 3 * 5 * 5),
        "conv1_b": uniform(ks[1], (6,), 3 * 5 * 5),
        "conv2_w": uniform(ks[2], (16, 6, 5, 5), 6 * 5 * 5),
        "conv2_b": uniform(ks[3], (16,), 6 * 5 * 5),
        # fc weights stored (in_features, out_features); fc1 rows ordered like
        # PyTorch's NCHW flatten (a loaded PyTorch (out,in) matrix would need a
        # transpose first).
        "fc1_w": uniform(ks[4], (16 * 5 * 5, 120), 16 * 5 * 5),
        "fc1_b": uniform(ks[5], (120,), 16 * 5 * 5),
        "fc2_w": uniform(ks[6], (120, 84), 120),
        "fc2_b": uniform(ks[7], (84,), 120),
        "fc3_w": uniform(ks[8], (84, 10), 84),
        "fc3_b": uniform(ks[9], (10,), 84),
    }


# ----------------------------------------------------------------------------
# Forward pass (mirrors LeNet_FA.forward); FA only changes the backward pass.
# ----------------------------------------------------------------------------
def lenet_fa_forward(prep, x_nchw):
    B = x_nchw.shape[0]
    x = jnp.transpose(x_nchw, (0, 2, 3, 1))            # NCHW -> NHWC (B,32,32,3)
    x = x.reshape(B, 32, 32 * 3)                       # pack (W,Cin) into lanes (free)
    y = conv_relu_pool(x, prep["conv1"])               # (B, 14, 14*6) == next (H, W*Cin)
    y = conv_relu_pool(y, prep["conv2"])               # (B, 5, 5*16)
    flat = y.reshape(B, 16 * 5 * 5)                    # NHWC flatten (free reshape)
    out = fc_chain(flat, prep["fc1_w"], prep["fc1_b"],
                   prep["fc2_w"], prep["fc2_b"],
                   prep["fc3_w"], prep["fc3_b"])       # (B, 128) lane-dense
    return out[:, :10]                                 # un-pad the logits


if __name__ == "__main__":
    key = jax.random.PRNGKey(0)
    pkey, xkey = jax.random.split(key)
    params = init_params(pkey)
    prep = prepare_params(params)                      # one-time weight prep
    # LeNet's 16*5*5 flatten implies 3x32x32 inputs (CIFAR-size); batch=2.
    x = jax.random.normal(xkey, (2, 3, 32, 32), jnp.float32)
    fwd = jax.jit(lenet_fa_forward)
    out = fwd(prep, x)
    jax.block_until_ready(out)
    assert out.shape == (2, 10) and out.dtype == jnp.float32
    print("KERNEL_OK")
</pallas_src>

<mosaic_0001>
module attributes {stable_mosaic.version = 11 : i64} {
  func.func @_conv_relu_pool_kernel(%arg0: i32, %arg1: memref<1x32x96xf32, #tpu.memory_space<vmem>>, %arg2: memref<5x96x168xf32, #tpu.memory_space<vmem>>, %arg3: memref<1x168xf32, #tpu.memory_space<vmem>>, %arg4: memref<168x84xf32, #tpu.memory_space<vmem>>, %arg5: memref<168x84xf32, #tpu.memory_space<vmem>>, %arg6: memref<14x28xf32, #tpu.memory_space<vmem>>, %arg7: memref<14x28xf32, #tpu.memory_space<vmem>>, %arg8: memref<1x14x84xf32, #tpu.memory_space<vmem>>) attributes {dimension_semantics = [#tpu.dimension_semantics<parallel>], iteration_bounds = array<i64: 2>, scalar_prefetch = 0 : i64, scratch_operands = 0 : i64, tpu.core_type = #tpu.core_type<tc>, window_params = [{transform_indices = @transform_0, window_bounds = array<i64: 1, 32, 96>}, {pipeline_mode = #tpu.pipeline_mode<synchronous>, transform_indices = @transform_1, window_bounds = array<i64: 5, 96, 168>}, {pipeline_mode = #tpu.pipeline_mode<synchronous>, transform_indices = @transform_2, window_bounds = array<i64: 1, 168>}, {pipeline_mode = #tpu.pipeline_mode<synchronous>, transform_indices = @transform_3, window_bounds = array<i64: 168, 84>}, {pipeline_mode = #tpu.pipeline_mode<synchronous>, transform_indices = @transform_4, window_bounds = array<i64: 168, 84>}, {pipeline_mode = #tpu.pipeline_mode<synchronous>, transform_indices = @transform_5, window_bounds = array<i64: 14, 28>}, {pipeline_mode = #tpu.pipeline_mode<synchronous>, transform_indices = @transform_6, window_bounds = array<i64: 14, 28>}, {transform_indices = @transform_7, window_bounds = array<i64: 1, 14, 84>}]} {
    %cst = arith.constant 0.000000e+00 : f32
    %0 = vector.broadcast %cst : f32 to vector<28x168xf32>
    %c0 = arith.constant 0 : index
    %c0_0 = arith.constant 0 : index
    %c0_1 = arith.constant 0 : index
    %1 = vector.load %arg1[%c0, %c0_0, %c0_1] : memref<1x32x96xf32, #tpu.memory_space<vmem>>, vector<1x28x96xf32>
    %2 = vector.shape_cast %1 : vector<1x28x96xf32> to vector<28x96xf32>
    %c0_2 = arith.constant 0 : index
    %c0_3 = arith.constant 0 : index
    %c0_4 = arith.constant 0 : index
    %3 = vector.load %arg2[%c0_2, %c0_3, %c0_4] : memref<5x96x168xf32, #tpu.memory_space<vmem>>, vector<1x96x168xf32>
    %4 = vector.shape_cast %3 : vector<1x96x168xf32> to vector<96x168xf32>
    %cst_5 = arith.constant dense<0.000000e+00> : vector<28x168xf32>
    %5 = tpu.matmul %2, %4, %cst_5 {dimension_numbers = #tpu.dot_dimension_numbers<[1], [0], [0], [1], [0, 0, 1, 1], [], []>} : vector<28x96xf32>, vector<96x168xf32>, vector<28x168xf32> -> vector<28x168xf32>
    %6 = arith.addf %0, %5 : vector<28x168xf32>
    %c0_6 = arith.constant 0 : index
    %c1 = arith.constant 1 : index
    %c0_7 = arith.constant 0 : index
    %7 = vector.load %arg1[%c0_6, %c1, %c0_7] : memref<1x32x96xf32, #tpu.memory_space<vmem>>, vector<1x28x96xf32>
    %8 = vector.shape_cast %7 : vector<1x28x96xf32> to vector<28x96xf32>
    %c1_8 = arith.constant 1 : index
    %c0_9 = arith.constant 0 : index
    %c0_10 = arith.constant 0 : index
    %9 = vector.load %arg2[%c1_8, %c0_9, %c0_10] : memref<5x96x168xf32, #tpu.memory_space<vmem>>, vector<1x96x168xf32>
    %10 = vector.shape_cast %9 : vector<1x96x168xf32> to vector<96x168xf32>
    %cst_11 = arith.constant dense<0.000000e+00> : vector<28x168xf32>
    %11 = tpu.matmul %8, %10, %cst_11 {dimension_numbers = #tpu.dot_dimension_numbers<[1], [0], [0], [1], [0, 0, 1, 1], [], []>} : vector<28x96xf32>, vector<96x168xf32>, vector<28x168xf32> -> vector<28x168xf32>
    %12 = arith.addf %6, %11 : vector<28x168xf32>
    %c0_12 = arith.constant 0 : index
    %c2 = arith.constant 2 : index
    %c0_13 = arith.constant 0 : index
    %13 = vector.load %arg1[%c0_12, %c2, %c0_13] : memref<1x32x96xf32, #tpu.memory_space<vmem>>, vector<1x28x96xf32>
    %14 = vector.shape_cast %13 : vector<1x28x96xf32> to vector<28x96xf32>
    %c2_14 = arith.constant 2 : index
    %c0_15 = arith.constant 0 : index
    %c0_16 = arith.constant 0 : index
    %15 = vector.load %arg2[%c2_14, %c0_15, %c0_16] : memref<5x96x168xf32, #tpu.memory_space<vmem>>, vector<1x96x168xf32>
    %16 = vector.shape_cast %15 : vector<1x96x168xf32> to vector<96x168xf32>
    %cst_17 = arith.constant dense<0.000000e+00> : vector<28x168xf32>
    %17 = tpu.matmul %14, %16, %cst_17 {dimension_numbers = #tpu.dot_dimension_numbers<[1], [0], [0], [1], [0, 0, 1, 1], [], []>} : vector<28x96xf32>, vector<96x168xf32>, vector<28x168xf32> -> vector<28x168xf32>
    %18 = arith.addf %12, %17 : vector<28x168xf32>
    %c0_18 = arith.constant 0 : index
    %c3 = arith.constant 3 : index
    %c0_19 = arith.constant 0 : index
    %19 = vector.load %arg1[%c0_18, %c3, %c0_19] : memref<1x32x96xf32, #tpu.memory_space<vmem>>, vector<1x28x96xf32>
    %20 = vector.shape_cast %19 : vector<1x28x96xf32> to vector<28x96xf32>
    %c3_20 = arith.constant 3 : index
    %c0_21 = arith.constant 0 : index
    %c0_22 = arith.constant 0 : index
    %21 = vector.load %arg2[%c3_20, %c0_21, %c0_22] : memref<5x96x168xf32, #tpu.memory_space<vmem>>, vector<1x96x168xf32>
    %22 = vector.shape_cast %21 : vector<1x96x168xf32> to vector<96x168xf32>
    %cst_23 = arith.constant dense<0.000000e+00> : vector<28x168xf32>
    %23 = tpu.matmul %20, %22, %cst_23 {dimension_numbers = #tpu.dot_dimension_numbers<[1], [0], [0], [1], [0, 0, 1, 1], [], []>} : vector<28x96xf32>, vector<96x168xf32>, vector<28x168xf32> -> vector<28x168xf32>
    %24 = arith.addf %18, %23 : vector<28x168xf32>
    %c0_24 = arith.constant 0 : index
    %c4 = arith.constant 4 : index
    %c0_25 = arith.constant 0 : index
    %25 = vector.load %arg1[%c0_24, %c4, %c0_25] : memref<1x32x96xf32, #tpu.memory_space<vmem>>, vector<1x28x96xf32>
    %26 = vector.shape_cast %25 : vector<1x28x96xf32> to vector<28x96xf32>
    %c4_26 = arith.constant 4 : index
    %c0_27 = arith.constant 0 : index
    %c0_28 = arith.constant 0 : index
    %27 = vector.load %arg2[%c4_26, %c0_27, %c0_28] : memref<5x96x168xf32, #tpu.memory_space<vmem>>, vector<1x96x168xf32>
    %28 = vector.shape_cast %27 : vector<1x96x168xf32> to vector<96x168xf32>
    %cst_29 = arith.constant dense<0.000000e+00> : vector<28x168xf32>
    %29 = tpu.matmul %26, %28, %cst_29 {dimension_numbers = #tpu.dot_dimension_numbers<[1], [0], [0], [1], [0, 0, 1, 1], [], []>} : vector<28x96xf32>, vector<96x168xf32>, vector<28x168xf32> -> vector<28x168xf32>
    %30 = arith.addf %24, %29 : vector<28x168xf32>
    %c0_30 = arith.constant 0 : index
    %c0_31 = arith.constant 0 : index
    %31 = vector.load %arg3[%c0_30, %c0_31] : memref<1x168xf32, #tpu.memory_space<vmem>>, vector<1x168xf32>
    %32 = vector.broadcast %31 : vector<1x168xf32> to vector<28x168xf32>
    %33 = arith.addf %30, %32 : vector<28x168xf32>
    %cst_32 = arith.constant 0.000000e+00 : f32
    %34 = vector.broadcast %cst_32 : f32 to vector<28x168xf32>
    %35 = arith.maximumf %33, %34 : vector<28x168xf32>
    %c0_33 = arith.constant 0 : index
    %c0_34 = arith.constant 0 : index
    %36 = vector.load %arg4[%c0_33, %c0_34] : memref<168x84xf32, #tpu.memory_space<vmem>>, vector<168x84xf32>
    %cst_35 = arith.constant dense<0.000000e+00> : vector<28x84xf32>
    %37 = tpu.matmul %35, %36, %cst_35 {dimension_numbers = #tpu.dot_dimension_numbers<[1], [0], [0], [1], [0, 0, 1, 1], [], []>} : vector<28x168xf32>, vector<168x84xf32>, vector<28x84xf32> -> vector<28x84xf32>
    %c0_36 = arith.constant 0 : index
    %c0_37 = arith.constant 0 : index
    %38 = vector.load %arg5[%c0_36, %c0_37] : memref<168x84xf32, #tpu.memory_space<vmem>>, vector<168x84xf32>
    %cst_38 = arith.constant dense<0.000000e+00> : vector<28x84xf32>
    %39 = tpu.matmul %35, %38, %cst_38 {dimension_numbers = #tpu.dot_dimension_numbers<[1], [0], [0], [1], [0, 0, 1, 1], [], []>} : vector<28x168xf32>, vector<168x84xf32>, vector<28x84xf32> -> vector<28x84xf32>
    %40 = arith.maximumf %37, %39 : vector<28x84xf32>
    %c0_39 = arith.constant 0 : index
    %c0_40 = arith.constant 0 : index
    %41 = vector.load %arg6[%c0_39, %c0_40] : memref<14x28xf32, #tpu.memory_space<vmem>>, vector<14x28xf32>
    %cst_41 = arith.constant dense<0.000000e+00> : vector<14x84xf32>
    %42 = tpu.matmul %41, %40, %cst_41 {dimension_numbers = #tpu.dot_dimension_numbers<[1], [0], [0], [1], [0, 0, 1, 1], [], []>} : vector<14x28xf32>, vector<28x84xf32>, vector<14x84xf32> -> vector<14x84xf32>
    %c0_42 = arith.constant 0 : index
    %c0_43 = arith.constant 0 : index
    %43 = vector.load %arg7[%c0_42, %c0_43] : memref<14x28xf32, #tpu.memory_space<vmem>>, vector<14x28xf32>
    %cst_44 = arith.constant dense<0.000000e+00> : vector<14x84xf32>
    %44 = tpu.matmul %43, %40, %cst_44 {dimension_numbers = #tpu.dot_dimension_numbers<[1], [0], [0], [1], [0, 0, 1, 1], [], []>} : vector<14x28xf32>, vector<28x84xf32>, vector<14x84xf32> -> vector<14x84xf32>
    %45 = arith.maximumf %42, %44 : vector<14x84xf32>
    %c0_45 = arith.constant 0 : index
    %c0_46 = arith.constant 0 : index
    %c0_47 = arith.constant 0 : index
    %46 = vector.load %arg8[%c0_45, %c0_46, %c0_47] : memref<1x14x84xf32, #tpu.memory_space<vmem>>, vector<1x14x84xf32>
    %47 = vector.shape_cast %46 : vector<1x14x84xf32> to vector<14x84xf32>
    %48 = vector.shape_cast %45 : vector<14x84xf32> to vector<1x14x84xf32>
    tpu.vector_store %arg8[%c0_45, %c0_46, %c0_47], %48 {strides = array<i32>} : memref<1x14x84xf32, #tpu.memory_space<vmem>>, vector<1x14x84xf32>,
    return
  }
  func.func @transform_0(%arg0: i32) -> (i32, i32, i32) {
    %c0_i32 = arith.constant 0 : i32
    %c0_i32_0 = arith.constant 0 : i32
    %c0_i32_1 = arith.constant 0 : i32
    return %arg0, %c0_i32, %c0_i32_0 : i32, i32, i32
  }
  func.func @transform_1(%arg0: i32) -> (i32, i32, i32) {
    %c0_i32 = arith.constant 0 : i32
    %c0_i32_0 = arith.constant 0 : i32
    %c0_i32_1 = arith.constant 0 : i32
    %c0_i32_2 = arith.constant 0 : i32
    return %c0_i32, %c0_i32_0, %c0_i32_1 : i32, i32, i32
  }
  func.func @transform_2(%arg0: i32) -> (i32, i32) {
    %c0_i32 = arith.constant 0 : i32
    %c0_i32_0 = arith.constant 0 : i32
    %c0_i32_1 = arith.constant 0 : i32
    return %c0_i32, %c0_i32_0 : i32, i32
  }
  func.func @transform_3(%arg0: i32) -> (i32, i32) {
    %c0_i32 = arith.constant 0 : i32
    %c0_i32_0 = arith.constant 0 : i32
    %c0_i32_1 = arith.constant 0 : i32
    return %c0_i32, %c0_i32_0 : i32, i32
  }
  func.func @transform_4(%arg0: i32) -> (i32, i32) {
    %c0_i32 = arith.constant 0 : i32
    %c0_i32_0 = arith.constant 0 : i32
    %c0_i32_1 = arith.constant 0 : i32
    return %c0_i32, %c0_i32_0 : i32, i32
  }
  func.func @transform_5(%arg0: i32) -> (i32, i32) {
    %c0_i32 = arith.constant 0 : i32
    %c0_i32_0 = arith.constant 0 : i32
    %c0_i32_1 = arith.constant 0 : i32
    return %c0_i32, %c0_i32_0 : i32, i32
  }
  func.func @transform_6(%arg0: i32) -> (i32, i32) {
    %c0_i32 = arith.constant 0 : i32
    %c0_i32_0 = arith.constant 0 : i32
    %c0_i32_1 = arith.constant 0 : i32
    return %c0_i32, %c0_i32_0 : i32, i32
  }
  func.func @transform_7(%arg0: i32) -> (i32, i32, i32) {
    %c0_i32 = arith.constant 0 : i32
    %c0_i32_0 = arith.constant 0 : i32
    %c0_i32_1 = arith.constant 0 : i32
    return %arg0, %c0_i32, %c0_i32_0 : i32, i32, i32
  }
}

module attributes {stable_mosaic.version = 11 : i64} {
  func.func @_conv_relu_pool_kernel(%arg0: i32, %arg1: memref<1x14x84xf32, #tpu.memory_space<vmem>>, %arg2: memref<5x84x160xf32, #tpu.memory_space<vmem>>, %arg3: memref<1x160xf32, #tpu.memory_space<vmem>>, %arg4: memref<160x80xf32, #tpu.memory_space<vmem>>, %arg5: memref<160x80xf32, #tpu.memory_space<vmem>>, %arg6: memref<5x10xf32, #tpu.memory_space<vmem>>, %arg7: memref<5x10xf32, #tpu.memory_space<vmem>>, %arg8: memref<1x5x80xf32, #tpu.memory_space<vmem>>) attributes {dimension_semantics = [#tpu.dimension_semantics<parallel>], iteration_bounds = array<i64: 2>, scalar_prefetch = 0 : i64, scratch_operands = 0 : i64, tpu.core_type = #tpu.core_type<tc>, window_params = [{transform_indices = @transform_0, window_bounds = array<i64: 1, 14, 84>}, {pipeline_mode = #tpu.pipeline_mode<synchronous>, transform_indices = @transform_1, window_bounds = array<i64: 5, 84, 160>}, {pipeline_mode = #tpu.pipeline_mode<synchronous>, transform_indices = @transform_2, window_bounds = array<i64: 1, 160>}, {pipeline_mode = #tpu.pipeline_mode<synchronous>, transform_indices = @transform_3, window_bounds = array<i64: 160, 80>}, {pipeline_mode = #tpu.pipeline_mode<synchronous>, transform_indices = @transform_4, window_bounds = array<i64: 160, 80>}, {pipeline_mode = #tpu.pipeline_mode<synchronous>, transform_indices = @transform_5, window_bounds = array<i64: 5, 10>}, {pipeline_mode = #tpu.pipeline_mode<synchronous>, transform_indices = @transform_6, window_bounds = array<i64: 5, 10>}, {transform_indices = @transform_7, window_bounds = array<i64: 1, 5, 80>}]} {
    %cst = arith.constant 0.000000e+00 : f32
    %0 = vector.broadcast %cst : f32 to vector<10x160xf32>
    %c0 = arith.constant 0 : index
    %c0_0 = arith.constant 0 : index
    %c0_1 = arith.constant 0 : index
    %1 = vector.load %arg1[%c0, %c0_0, %c0_1] : memref<1x14x84xf32, #tpu.memory_space<vmem>>, vector<1x10x84xf32>
    %2 = vector.shape_cast %1 : vector<1x10x84xf32> to vector<10x84xf32>
    %c0_2 = arith.constant 0 : index
    %c0_3 = arith.constant 0 : index
    %c0_4 = arith.constant 0 : index
    %3 = vector.load %arg2[%c0_2, %c0_3, %c0_4] : memref<5x84x160xf32, #tpu.memory_space<vmem>>, vector<1x84x160xf32>
    %4 = vector.shape_cast %3 : vector<1x84x160xf32> to vector<84x160xf32>
    %cst_5 = arith.constant dense<0.000000e+00> : vector<10x160xf32>
    %5 = tpu.matmul %2, %4, %cst_5 {dimension_numbers = #tpu.dot_dimension_numbers<[1], [0], [0], [1], [0, 0, 1, 1], [], []>} : vector<10x84xf32>, vector<84x160xf32>, vector<10x160xf32> -> vector<10x160xf32>
    %6 = arith.addf %0, %5 : vector<10x160xf32>
    %c0_6 = arith.constant 0 : index
    %c1 = arith.constant 1 : index
    %c0_7 = arith.constant 0 : index
    %7 = vector.load %arg1[%c0_6, %c1, %c0_7] : memref<1x14x84xf32, #tpu.memory_space<vmem>>, vector<1x10x84xf32>
    %8 = vector.shape_cast %7 : vector<1x10x84xf32> to vector<10x84xf32>
    %c1_8 = arith.constant 1 : index
    %c0_9 = arith.constant 0 : index
    %c0_10 = arith.constant 0 : index
    %9 = vector.load %arg2[%c1_8, %c0_9, %c0_10] : memref<5x84x160xf32, #tpu.memory_space<vmem>>, vector<1x84x160xf32>
    %10 = vector.shape_cast %9 : vector<1x84x160xf32> to vector<84x160xf32>
    %cst_11 = arith.constant dense<0.000000e+00> : vector<10x160xf32>
    %11 = tpu.matmul %8, %10, %cst_11 {dimension_numbers = #tpu.dot_dimension_numbers<[1], [0], [0], [1], [0, 0, 1, 1], [], []>} : vector<10x84xf32>, vector<84x160xf32>, vector<10x160xf32> -> vector<10x160xf32>
    %12 = arith.addf %6, %11 : vector<10x160xf32>
    %c0_12 = arith.constant 0 : index
    %c2 = arith.constant 2 : index
    %c0_13 = arith.constant 0 : index
    %13 = vector.load %arg1[%c0_12, %c2, %c0_13] : memref<1x14x84xf32, #tpu.memory_space<vmem>>, vector<1x10x84xf32>
    %14 = vector.shape_cast %13 : vector<1x10x84xf32> to vector<10x84xf32>
    %c2_14 = arith.constant 2 : index
    %c0_15 = arith.constant 0 : index
    %c0_16 = arith.constant 0 : index
    %15 = vector.load %arg2[%c2_14, %c0_15, %c0_16] : memref<5x84x160xf32, #tpu.memory_space<vmem>>, vector<1x84x160xf32>
    %16 = vector.shape_cast %15 : vector<1x84x160xf32> to vector<84x160xf32>
    %cst_17 = arith.constant dense<0.000000e+00> : vector<10x160xf32>
    %17 = tpu.matmul %14, %16, %cst_17 {dimension_numbers = #tpu.dot_dimension_numbers<[1], [0], [0], [1], [0, 0, 1, 1], [], []>} : vector<10x84xf32>, vector<84x160xf32>, vector<10x160xf32> -> vector<10x160xf32>
    %18 = arith.addf %12, %17 : vector<10x160xf32>
    %c0_18 = arith.constant 0 : index
    %c3 = arith.constant 3 : index
    %c0_19 = arith.constant 0 : index
    %19 = vector.load %arg1[%c0_18, %c3, %c0_19] : memref<1x14x84xf32, #tpu.memory_space<vmem>>, vector<1x10x84xf32>
    %20 = vector.shape_cast %19 : vector<1x10x84xf32> to vector<10x84xf32>
    %c3_20 = arith.constant 3 : index
    %c0_21 = arith.constant 0 : index
    %c0_22 = arith.constant 0 : index
    %21 = vector.load %arg2[%c3_20, %c0_21, %c0_22] : memref<5x84x160xf32, #tpu.memory_space<vmem>>, vector<1x84x160xf32>
    %22 = vector.shape_cast %21 : vector<1x84x160xf32> to vector<84x160xf32>
    %cst_23 = arith.constant dense<0.000000e+00> : vector<10x160xf32>
    %23 = tpu.matmul %20, %22, %cst_23 {dimension_numbers = #tpu.dot_dimension_numbers<[1], [0], [0], [1], [0, 0, 1, 1], [], []>} : vector<10x84xf32>, vector<84x160xf32>, vector<10x160xf32> -> vector<10x160xf32>
    %24 = arith.addf %18, %23 : vector<10x160xf32>
    %c0_24 = arith.constant 0 : index
    %c4 = arith.constant 4 : index
    %c0_25 = arith.constant 0 : index
    %25 = vector.load %arg1[%c0_24, %c4, %c0_25] : memref<1x14x84xf32, #tpu.memory_space<vmem>>, vector<1x10x84xf32>
    %26 = vector.shape_cast %25 : vector<1x10x84xf32> to vector<10x84xf32>
    %c4_26 = arith.constant 4 : index
    %c0_27 = arith.constant 0 : index
    %c0_28 = arith.constant 0 : index
    %27 = vector.load %arg2[%c4_26, %c0_27, %c0_28] : memref<5x84x160xf32, #tpu.memory_space<vmem>>, vector<1x84x160xf32>
    %28 = vector.shape_cast %27 : vector<1x84x160xf32> to vector<84x160xf32>
    %cst_29 = arith.constant dense<0.000000e+00> : vector<10x160xf32>
    %29 = tpu.matmul %26, %28, %cst_29 {dimension_numbers = #tpu.dot_dimension_numbers<[1], [0], [0], [1], [0, 0, 1, 1], [], []>} : vector<10x84xf32>, vector<84x160xf32>, vector<10x160xf32> -> vector<10x160xf32>
    %30 = arith.addf %24, %29 : vector<10x160xf32>
    %c0_30 = arith.constant 0 : index
    %c0_31 = arith.constant 0 : index
    %31 = vector.load %arg3[%c0_30, %c0_31] : memref<1x160xf32, #tpu.memory_space<vmem>>, vector<1x160xf32>
    %32 = vector.broadcast %31 : vector<1x160xf32> to vector<10x160xf32>
    %33 = arith.addf %30, %32 : vector<10x160xf32>
    %cst_32 = arith.constant 0.000000e+00 : f32
    %34 = vector.broadcast %cst_32 : f32 to vector<10x160xf32>
    %35 = arith.maximumf %33, %34 : vector<10x160xf32>
    %c0_33 = arith.constant 0 : index
    %c0_34 = arith.constant 0 : index
    %36 = vector.load %arg4[%c0_33, %c0_34] : memref<160x80xf32, #tpu.memory_space<vmem>>, vector<160x80xf32>
    %cst_35 = arith.constant dense<0.000000e+00> : vector<10x80xf32>
    %37 = tpu.matmul %35, %36, %cst_35 {dimension_numbers = #tpu.dot_dimension_numbers<[1], [0], [0], [1], [0, 0, 1, 1], [], []>} : vector<10x160xf32>, vector<160x80xf32>, vector<10x80xf32> -> vector<10x80xf32>
    %c0_36 = arith.constant 0 : index
    %c0_37 = arith.constant 0 : index
    %38 = vector.load %arg5[%c0_36, %c0_37] : memref<160x80xf32, #tpu.memory_space<vmem>>, vector<160x80xf32>
    %cst_38 = arith.constant dense<0.000000e+00> : vector<10x80xf32>
    %39 = tpu.matmul %35, %38, %cst_38 {dimension_numbers = #tpu.dot_dimension_numbers<[1], [0], [0], [1], [0, 0, 1, 1], [], []>} : vector<10x160xf32>, vector<160x80xf32>, vector<10x80xf32> -> vector<10x80xf32>
    %40 = arith.maximumf %37, %39 : vector<10x80xf32>
    %c0_39 = arith.constant 0 : index
    %c0_40 = arith.constant 0 : index
    %41 = vector.load %arg6[%c0_39, %c0_40] : memref<5x10xf32, #tpu.memory_space<vmem>>, vector<5x10xf32>
    %cst_41 = arith.constant dense<0.000000e+00> : vector<5x80xf32>
    %42 = tpu.matmul %41, %40, %cst_41 {dimension_numbers = #tpu.dot_dimension_numbers<[1], [0], [0], [1], [0, 0, 1, 1], [], []>} : vector<5x10xf32>, vector<10x80xf32>, vector<5x80xf32> -> vector<5x80xf32>
    %c0_42 = arith.constant 0 : index
    %c0_43 = arith.constant 0 : index
    %43 = vector.load %arg7[%c0_42, %c0_43] : memref<5x10xf32, #tpu.memory_space<vmem>>, vector<5x10xf32>
    %cst_44 = arith.constant dense<0.000000e+00> : vector<5x80xf32>
    %44 = tpu.matmul %43, %40, %cst_44 {dimension_numbers = #tpu.dot_dimension_numbers<[1], [0], [0], [1], [0, 0, 1, 1], [], []>} : vector<5x10xf32>, vector<10x80xf32>, vector<5x80xf32> -> vector<5x80xf32>
    %45 = arith.maximumf %42, %44 : vector<5x80xf32>
    %c0_45 = arith.constant 0 : index
    %c0_46 = arith.constant 0 : index
    %c0_47 = arith.constant 0 : index
    %46 = vector.load %arg8[%c0_45, %c0_46, %c0_47] : memref<1x5x80xf32, #tpu.memory_space<vmem>>, vector<1x5x80xf32>
    %47 = vector.shape_cast %46 : vector<1x5x80xf32> to vector<5x80xf32>
    %48 = vector.shape_cast %45 : vector<5x80xf32> to vector<1x5x80xf32>
    tpu.vector_store %arg8[%c0_45, %c0_46, %c0_47], %48 {strides = array<i32>} : memref<1x5x80xf32, #tpu.memory_space<vmem>>, vector<1x5x80xf32>,
    return
  }
  func.func @transform_0(%arg0: i32) -> (i32, i32, i32) {
    %c0_i32 = arith.constant 0 : i32
    %c0_i32_0 = arith.constant 0 : i32
    %c0_i32_1 = arith.constant 0 : i32
    return %arg0, %c0_i32, %c0_i32_0 : i32, i32, i32
  }
  func.func @transform_1(%arg0: i32) -> (i32, i32, i32) {
    %c0_i32 = arith.constant 0 : i32
    %c0_i32_0 = arith.constant 0 : i32
    %c0_i32_1 = arith.constant 0 : i32
    %c0_i32_2 = arith.constant 0 : i32
    return %c0_i32, %c0_i32_0, %c0_i32_1 : i32, i32, i32
  }
  func.func @transform_2(%arg0: i32) -> (i32, i32) {
    %c0_i32 = arith.constant 0 : i32
    %c0_i32_0 = arith.constant 0 : i32
    %c0_i32_1 = arith.constant 0 : i32
    return %c0_i32, %c0_i32_0 : i32, i32
  }
  func.func @transform_3(%arg0: i32) -> (i32, i32) {
    %c0_i32 = arith.constant 0 : i32
    %c0_i32_0 = arith.constant 0 : i32
    %c0_i32_1 = arith.constant 0 : i32
    return %c0_i32, %c0_i32_0 : i32, i32
  }
  func.func @transform_4(%arg0: i32) -> (i32, i32) {
    %c0_i32 = arith.constant 0 : i32
    %c0_i32_0 = arith.constant 0 : i32
    %c0_i32_1 = arith.constant 0 : i32
    return %c0_i32, %c0_i32_0 : i32, i32
  }
  func.func @transform_5(%arg0: i32) -> (i32, i32) {
    %c0_i32 = arith.constant 0 : i32
    %c0_i32_0 = arith.constant 0 : i32
    %c0_i32_1 = arith.constant 0 : i32
    return %c0_i32, %c0_i32_0 : i32, i32
  }
  func.func @transform_6(%arg0: i32) -> (i32, i32) {
    %c0_i32 = arith.constant 0 : i32
    %c0_i32_0 = arith.constant 0 : i32
    %c0_i32_1 = arith.constant 0 : i32
    return %c0_i32, %c0_i32_0 : i32, i32
  }
  func.func @transform_7(%arg0: i32) -> (i32, i32, i32) {
    %c0_i32 = arith.constant 0 : i32
    %c0_i32_0 = arith.constant 0 : i32
    %c0_i32_1 = arith.constant 0 : i32
    return %arg0, %c0_i32, %c0_i32_0 : i32, i32, i32
  }
}

module attributes {stable_mosaic.version = 11 : i64} {
  func.func @_fc_chain_kernel(%arg0: i32, %arg1: memref<2x400xf32, #tpu.memory_space<vmem>>, %arg2: memref<400x120xf32, #tpu.memory_space<vmem>>, %arg3: memref<1x120xf32, #tpu.memory_space<vmem>>, %arg4: memref<120x84xf32, #tpu.memory_space<vmem>>, %arg5: memref<1x84xf32, #tpu.memory_space<vmem>>, %arg6: memref<84x128xf32, #tpu.memory_space<vmem>>, %arg7: memref<1x128xf32, #tpu.memory_space<vmem>>, %arg8: memref<2x128xf32, #tpu.memory_space<vmem>>) attributes {dimension_semantics = [#tpu.dimension_semantics<parallel>], iteration_bounds = array<i64: 1>, scalar_prefetch = 0 : i64, scratch_operands = 0 : i64, tpu.core_type = #tpu.core_type<tc>, window_params = [{transform_indices = @transform_0, window_bounds = array<i64: 2, 400>}, {pipeline_mode = #tpu.pipeline_mode<synchronous>, transform_indices = @transform_1, window_bounds = array<i64: 400, 120>}, {pipeline_mode = #tpu.pipeline_mode<synchronous>, transform_indices = @transform_2, window_bounds = array<i64: 1, 120>}, {pipeline_mode = #tpu.pipeline_mode<synchronous>, transform_indices = @transform_3, window_bounds = array<i64: 120, 84>}, {pipeline_mode = #tpu.pipeline_mode<synchronous>, transform_indices = @transform_4, window_bounds = array<i64: 1, 84>}, {pipeline_mode = #tpu.pipeline_mode<synchronous>, transform_indices = @transform_5, window_bounds = array<i64: 84, 128>}, {pipeline_mode = #tpu.pipeline_mode<synchronous>, transform_indices = @transform_6, window_bounds = array<i64: 1, 128>}, {transform_indices = @transform_7, window_bounds = array<i64: 2, 128>}]} {
    %c0 = arith.constant 0 : index
    %c0_0 = arith.constant 0 : index
    %0 = vector.load %arg1[%c0, %c0_0] : memref<2x400xf32, #tpu.memory_space<vmem>>, vector<2x400xf32>
    %c0_1 = arith.constant 0 : index
    %c0_2 = arith.constant 0 : index
    %1 = vector.load %arg2[%c0_1, %c0_2] : memref<400x120xf32, #tpu.memory_space<vmem>>, vector<400x120xf32>
    %cst = arith.constant dense<0.000000e+00> : vector<2x120xf32>
    %2 = tpu.matmul %0, %1, %cst {dimension_numbers = #tpu.dot_dimension_numbers<[1], [0], [0], [1], [0, 0, 1, 1], [], []>} : vector<2x400xf32>, vector<400x120xf32>, vector<2x120xf32> -> vector<2x120xf32>
    %c0_3 = arith.constant 0 : index
    %c0_4 = arith.constant 0 : index
    %3 = vector.load %arg3[%c0_3, %c0_4] : memref<1x120xf32, #tpu.memory_space<vmem>>, vector<1x120xf32>
    %4 = vector.broadcast %3 : vector<1x120xf32> to vector<2x120xf32>
    %5 = arith.addf %2, %4 : vector<2x120xf32>
    %cst_5 = arith.constant 0.000000e+00 : f32
    %6 = vector.broadcast %cst_5 : f32 to vector<2x120xf32>
    %7 = arith.maximumf %5, %6 : vector<2x120xf32>
    %c0_6 = arith.constant 0 : index
    %c0_7 = arith.constant 0 : index
    %8 = vector.load %arg4[%c0_6, %c0_7] : memref<120x84xf32, #tpu.memory_space<vmem>>, vector<120x84xf32>
    %cst_8 = arith.constant dense<0.000000e+00> : vector<2x84xf32>
    %9 = tpu.matmul %7, %8, %cst_8 {dimension_numbers = #tpu.dot_dimension_numbers<[1], [0], [0], [1], [0, 0, 1, 1], [], []>} : vector<2x120xf32>, vector<120x84xf32>, vector<2x84xf32> -> vector<2x84xf32>
    %c0_9 = arith.constant 0 : index
    %c0_10 = arith.constant 0 : index
    %10 = vector.load %arg5[%c0_9, %c0_10] : memref<1x84xf32, #tpu.memory_space<vmem>>, vector<1x84xf32>
    %11 = vector.broadcast %10 : vector<1x84xf32> to vector<2x84xf32>
    %12 = arith.addf %9, %11 : vector<2x84xf32>
    %cst_11 = arith.constant 0.000000e+00 : f32
    %13 = vector.broadcast %cst_11 : f32 to vector<2x84xf32>
    %14 = arith.maximumf %12, %13 : vector<2x84xf32>
    %c0_12 = arith.constant 0 : index
    %c0_13 = arith.constant 0 : index
    %15 = vector.load %arg6[%c0_12, %c0_13] : memref<84x128xf32, #tpu.memory_space<vmem>>, vector<84x128xf32>
    %cst_14 = arith.constant dense<0.000000e+00> : vector<2x128xf32>
    %16 = tpu.matmul %14, %15, %cst_14 {dimension_numbers = #tpu.dot_dimension_numbers<[1], [0], [0], [1], [0, 0, 1, 1], [], []>} : vector<2x84xf32>, vector<84x128xf32>, vector<2x128xf32> -> vector<2x128xf32>
    %c0_15 = arith.constant 0 : index
    %c0_16 = arith.constant 0 : index
    %17 = vector.load %arg7[%c0_15, %c0_16] : memref<1x128xf32, #tpu.memory_space<vmem>>, vector<1x128xf32>
    %18 = vector.broadcast %17 : vector<1x128xf32> to vector<2x128xf32>
    %19 = arith.addf %16, %18 : vector<2x128xf32>
    %c0_17 = arith.constant 0 : index
    %c0_18 = arith.constant 0 : index
    %20 = vector.load %arg8[%c0_17, %c0_18] : memref<2x128xf32, #tpu.memory_space<vmem>>, vector<2x128xf32>
    tpu.vector_store %arg8[%c0_17, %c0_18], %19 {strides = array<i32>} : memref<2x128xf32, #tpu.memory_space<vmem>>, vector<2x128xf32>,
    return
  }
  func.func @transform_0(%arg0: i32) -> (i32, i32) {
    %c0_i32 = arith.constant 0 : i32
    %c0_i32_0 = arith.constant 0 : i32
    return %arg0, %c0_i32 : i32, i32
  }
  func.func @transform_1(%arg0: i32) -> (i32, i32) {
    %c0_i32 = arith.constant 0 : i32
    %c0_i32_0 = arith.constant 0 : i32
    %c0_i32_1 = arith.constant 0 : i32
    return %c0_i32, %c0_i32_0 : i32, i32
  }
  func.func @transform_2(%arg0: i32) -> (i32, i32) {
    %c0_i32 = arith.constant 0 : i32
    %c0_i32_0 = arith.constant 0 : i32
    %c0_i32_1 = arith.constant 0 : i32
    return %c0_i32, %c0_i32_0 : i32, i32
  }
  func.func @transform_3(%arg0: i32) -> (i32, i32) {
    %c0_i32 = arith.constant 0 : i32
    %c0_i32_0 = arith.constant 0 : i32
    %c0_i32_1 = arith.constant 0 : i32
    return %c0_i32, %c0_i32_0 : i32, i32
  }
  func.func @transform_4(%arg0: i32) -> (i32, i32) {
    %c0_i32 = arith.constant 0 : i32
    %c0_i32_0 = arith.constant 0 : i32
    %c0_i32_1 = arith.constant 0 : i32
    return %c0_i32, %c0_i32_0 : i32, i32
  }
  func.func @transform_5(%arg0: i32) -> (i32, i32) {
    %c0_i32 = arith.constant 0 : i32
    %c0_i32_0 = arith.constant 0 : i32
    %c0_i32_1 = arith.constant 0 : i32
    return %c0_i32, %c0_i32_0 : i32, i32
  }
  func.func @transform_6(%arg0: i32) -> (i32, i32) {
    %c0_i32 = arith.constant 0 : i32
    %c0_i32_0 = arith.constant 0 : i32
    %c0_i32_1 = arith.constant 0 : i32
    return %c0_i32, %c0_i32_0 : i32, i32
  }
  func.func @transform_7(%arg0: i32) -> (i32, i32) {
    %c0_i32 = arith.constant 0 : i32
    %c0_i32_0 = arith.constant 0 : i32
    return %arg0, %c0_i32 : i32, i32
  }
}

</mosaic_0001>

<bundles_post_ra>
// kernel: lenet_fa_forward.5
= control target key start
LH: loop header
LB: loop body
LE: loop exit
PB: predicated region body
PF: predicated region fallthrough
CT: control target
= control target key end

     0   :  { %v711_v4 = vmov 0.0|0.0   ;;  %v712_v26 = vmov 1983009808   ;;  %v90_v28 = vlaneseq  ;;  %vm106_vm0 = vcmask 130048   ;;  %s1029_s0 = inlined_call_operand.vmem [shape: f32[2,400], index: 0, kind: input, shape index: {}]   ;;  %s1030_s1 = inlined_call_operand.vmem [shape: f32[400,120], index: 1, kind: input, shape index: {}]   ;;  %s1031_s2 = inlined_call_operand.vmem [shape: f32[1,120], index: 2, kind: input, shape index: {}]   ;;  %s1032_s3 = inlined_call_operand.vmem [shape: f32[120,84], index: 3, kind: input, shape index: {}]   ;;  %s1033_s4 = inlined_call_operand.vmem [shape: f32[1,84], index: 4, kind: input, shape index: {}]   ;;  %s1034_s5 = inlined_call_operand.vmem [shape: f32[84,128], index: 5, kind: input, shape index: {}]   ;;  %s1035_s6 = inlined_call_operand.vmem [shape: f32[1,128], index: 6, kind: input, shape index: {}]   ;;  %s1036_s7 = inlined_call_operand.hbm [shape: f32[2,128], index: 7, kind: output, shape index: {}]  }
   0x1   :  { %v44_v0 = vld [vmem:[%s1030_s1 + $0x80] sm:$0xff]  ;;  %v45_v1 = vld [vmem:[%s1030_s1 + $0x88] sm:$0xff]  ;;  %618 = vmatprep.subr.bf16.mxu1 %v711_v4  ;;  %v46_v10 = vld [vmem:[%s1030_s1 + $0x90] sm:$0xff]  ;;  %v88_v27 = vunpack.c.l.s4 %v712_v26 }
   0x2   :  { %v28_v2 = vld [vmem:[%s1030_s1] sm:$0xff]  ;;  %v586_v3 = vpack.c.bf16 %v45_v1, %v44_v0  ;;  %v29_v5 = vld [vmem:[%s1030_s1 + $0x8] sm:$0xff]  ;;  %v47_v11 = vld [vmem:[%s1030_s1 + $0x98] sm:$0xff]  ;;  %v91_v39 = vshrl.u32 %v90_v28, 7 }
   0x3   :  { %v60_v6 = vld [vmem:[%s1030_s1 + $0x100] sm:$0xff]  ;;  %v61_v7 = vld [vmem:[%s1030_s1 + $0x108] sm:$0xff]  ;;  %v588_v8 = vpack.c.bf16 %v29_v5, %v28_v2  ;;  %v30_v12 = vld [vmem:[%s1030_s1 + $0x10] sm:$0xff]  ;;  %v590_v13 = vpack.c.bf16 %v47_v11, %v46_v10  ;;  %v89_v38 = vunpack.c.0.s8 %v88_v27 }
   0x4   :  { %v619_v9 = vpack.c.bf16 %v61_v7, %v60_v6  ;;  %587 = vmatprep.subr.bf16.mxu0 %v586_v3  ;;  %v31_v14 = vld [vmem:[%s1030_s1 + $0x18] sm:$0xff]  ;;  %v62_v15 = vld [vmem:[%s1030_s1 + $0x110] sm:$0xff]  ;;  %v48_v19 = vld [vmem:[%s1030_s1 + $0xa0] sm:$0xff] }
   0x5   :  { %v63_v16 = vld [vmem:[%s1030_s1 + $0x118] sm:$0xff]  ;;  %589 = vmatpush3.bf16.msra.mxu0 %v588_v8  ;;  %v592_v17 = vpack.c.bf16 %v31_v14, %v30_v12  ;;  %v49_v20 = vld [vmem:[%s1030_s1 + $0xa8] sm:$0xff]  ;;  %v32_v21 = vld [vmem:[%s1030_s1 + $0x20] sm:$0xff]  ;;  %v92_v49 = vsub.s32 %v89_v38, %v91_v39 }
   0x6   :  { %620 = vmatpush1.bf16.msra.mxu1 %v619_v9  ;;  %v622_v18 = vpack.c.bf16 %v63_v16, %v62_v15  ;;  %591 = vmatprep.subr.bf16.mxu0 %v590_v13  ;;  %v594_v22 = vpack.c.bf16 %v49_v20, %v48_v19  ;;  %v33_v23 = vld [vmem:[%s1030_s1 + $0x28] sm:$0xff]  ;;  %v64_v24 = vld [vmem:[%s1030_s1 + $0x120] sm:$0xff]  ;;  %v50_v29 = vld [vmem:[%s1030_s1 + $0xb0] sm:$0xff] }
   0x7   :  { %621 = vmatprep.subr.bf16.mxu1 %v711_v4  ;;  %v65_v25 = vld [vmem:[%s1030_s1 + $0x128] sm:$0xff]  ;;  %v51_v30 = vld [vmem:[%s1030_s1 + $0xb8] sm:$0xff]  ;;  %v596_v31 = vpack.c.bf16 %v33_v23, %v32_v21  ;;  %v34_v33 = vld [vmem:[%s1030_s1 + $0x30] sm:$0xff] }
   0x8   :  { %v625_v32 = vpack.c.bf16 %v65_v25, %v64_v24  ;;  %v598_v34 = vpack.c.bf16 %v51_v30, %v50_v29  ;;  %v35_v35 = vld [vmem:[%s1030_s1 + $0x38] sm:$0xff]  ;;  %v66_v36 = vld [vmem:[%s1030_s1 + $0x130] sm:$0xff]  ;;  %v52_v40 = vld [vmem:[%s1030_s1 + $0xc0] sm:$0xff] }
   0x9   :  { %593 = vmatpush3.bf16.msra.mxu0 %v592_v17  ;;  %v67_v37 = vld [vmem:[%s1030_s1 + $0x138] sm:$0xff]  ;;  %v53_v41 = vld [vmem:[%s1030_s1 + $0xc8] sm:$0xff]  ;;  %v600_v42 = vpack.c.bf16 %v35_v35, %v34_v33  ;;  %v36_v44 = vld [vmem:[%s1030_s1 + $0x40] sm:$0xff] }
   0xa   :  { %623 = vmatpush1.bf16.msra.mxu1 %v622_v18  ;;  %595 = vmatprep.subr.bf16.mxu0 %v594_v22  ;;  %v628_v43 = vpack.c.bf16 %v67_v37, %v66_v36  ;;  %v602_v45 = vpack.c.bf16 %v53_v41, %v52_v40  ;;  %v37_v46 = vld [vmem:[%s1030_s1 + $0x48] sm:$0xff]  ;;  %v68_v47 = vld [vmem:[%s1030_s1 + $0x140] sm:$0xff]  ;;  %v54_v50 = vld [vmem:[%s1030_s1 + $0xd0] sm:$0xff] }
   0xb   :  { %624 = vmatprep.subr.bf16.mxu1 %v711_v4  ;;  %v69_v48 = vld [vmem:[%s1030_s1 + $0x148] sm:$0xff]  ;;  %v55_v51 = vld [vmem:[%s1030_s1 + $0xd8] sm:$0xff]  ;;  %v604_v52 = vpack.c.bf16 %v37_v46, %v36_v44  ;;  %v38_v54 = vld [vmem:[%s1030_s1 + $0x50] sm:$0xff] }
   0xc   :  { %v631_v53 = vpack.c.bf16 %v69_v48, %v68_v47  ;;  %v27_v55 = vld [vmem:[%s1029_s0] sm:$0xff]  ;;  %v606_v56 = vpack.c.bf16 %v55_v51, %v54_v50  ;;  %v39_v57 = vld [vmem:[%s1030_s1 + $0x58] sm:$0xff]  ;;  %v70_v58 = vld [vmem:[%s1030_s1 + $0x150] sm:$0xff] }
   0xd   :  { %597 = vmatpush3.bf16.msra.mxu0 %v596_v31  ;;  %v71_v59 = vld [vmem:[%s1030_s1 + $0x158] sm:$0xff]  ;;  %v86_v60 = vcombine.high %v27_v55, %v27_v55  ;;  %v93_v61 = vrot.slane %v27_v55, %v92_v49  ;;  %v56_v62 = vld [vmem:[%s1030_s1 + $0xe0] sm:$0xff]  ;;  %v57_v63 = vld [vmem:[%s1030_s1 + $0xe8] sm:$0xff]  ;;  %v608_v2 = vpack.c.bf16 %v39_v57, %v38_v54 }
   0xe   :  { %626 = vmatpush1.bf16.msra.mxu1 %v625_v32  ;;  %599 = vmatprep.subr.bf16.mxu0 %v598_v34  ;;  %v634_v3 = vpack.c.bf16 %v71_v59, %v70_v58  ;;  %v40_v5 = vld [vmem:[%s1030_s1 + $0x60] sm:$0xff] }
   0xf   :  { %627 = vmatprep.subr.bf16.mxu1 %v711_v4  ;;  %v101_v0 = vcombine.high %v93_v61, %v93_v61  ;;  %v100_v1 = vrot.slane %v86_v60, %v92_v49 }
  0x11   :  { %601 = vmatpush3.bf16.msra.mxu0 %v600_v42 }
  0x12   :  { %629 = vmatpush1.bf16.msra.mxu1 %v628_v43  ;;  %603 = vmatprep.subr.bf16.mxu0 %v602_v45 }
  0x13   :  { %630 = vmatprep.subr.bf16.mxu1 %v711_v4 }
  0x15   :  { %605 = vmatpush3.bf16.msra.mxu0 %v604_v52 }
  0x16   :  { %632 = vmatpush1.bf16.msra.mxu1 %v631_v53 }
  0x17   :  { %12 = vsyncpa [#allocation3], 0  ;;  %607 = vmatprep.subr.bf16.mxu0 %v606_v56  ;;  %633 = vmatprep.subr.bf16.mxu1 %v711_v4  ;;  %v610_v6 = vpack.c.bf16 %v57_v63, %v56_v62  ;;  %v41_v7 = vld [vmem:[%s1030_s1 + $0x68] sm:$0xff]  ;;  %v72_v8 = vld [vmem:[%s1030_s1 + $0x160] sm:$0xff]  ;;  %v102_v10 = vcombine.high %v100_v1, %v100_v1  ;;  %v713_v46 = vmov 0.0   ;;  %vm714_vm1 = vmmov 0  }
  0x18   :  { %v73_v9 = vld [vmem:[%s1030_s1 + $0x168] sm:$0xff]  ;;  %v58_v11 = vld [vmem:[%s1030_s1 + $0xf0] sm:$0xff]  ;;  %v59_v12 = vld [vmem:[%s1030_s1 + $0xf8] sm:$0xff]  ;;  %173 = vmatprep.mubr.f32.mxu0 %v101_v0  ;;  %v612_v13 = vpack.c.bf16 %v41_v7, %v40_v5  ;;  %vm272_vm2 = vcmask 982016   ;;  %vm369_vm3 = vcmask 1043456   ;;  %vm365_vm4 = vcmask 687104  }
  0x19   :  { %459 = vmatprep.mubr.msk.f32.mxu1 %vm106_vm0, %v102_v10  ;;  %609 = vmatpush3.bf16.msra.mxu0 %v608_v2  ;;  %v637_v14 = vpack.c.bf16 %v73_v9, %v72_v8  ;;  %v42_v15 = vld [vmem:[%s1030_s1 + $0x70] sm:$0xff]  ;;  %v614_v16 = vpack.c.bf16 %v59_v12, %v58_v11  ;;  %v43_v17 = vld [vmem:[%s1030_s1 + $0x78] sm:$0xff]  ;;  %v76_v22 = vld [vmem:[%s1030_s1 + $0x180] sm:$0xff] }
  0x1a   :  { %635 = vmatpush1.bf16.msra.mxu1 %v634_v3  ;;  %611 = vmatprep.subr.bf16.mxu0 %v610_v6  ;;  %v74_v18 = vld [vmem:[%s1030_s1 + $0x170] sm:$0xff]  ;;  %v75_v19 = vld [vmem:[%s1030_s1 + $0x178] sm:$0xff]  ;;  %v616_v20 = vpack.c.bf16 %v43_v17, %v42_v15  ;;  %v77_v23 = vld [vmem:[%s1030_s1 + $0x188] sm:$0xff]  ;;  %s715_s1 = smov [#allocation2]  }
  0x1b   :  { %636 = vmatprep.subr.bf16.mxu1 %v711_v4  ;;  %v640_v21 = vpack.c.bf16 %v75_v19, %v74_v18  ;;  %v250_v24 = vld [vmem:[%s1032_s3] sm:$0xff]  ;;  %v251_v25 = vld [vmem:[%s1032_s3 + $0x8] sm:$0xff]  ;;  %v643_v26 = vpack.c.bf16 %v77_v23, %v76_v22  ;;  %v252_v28 = vld [vmem:[%s1032_s3 + $0x10] sm:$0xff]  ;;  %s450_s15 = sshll.u32 %s715_s1, 4  ;;  %s451_s15 = int_to_ptr.vmem [resolvable:$true] %s450_s15 }
  0x1c   :  { %v646_v27 = vpack.c.bf16 %v251_v25, %v250_v24  ;;  %v253_v29 = vld [vmem:[%s1032_s3 + $0x18] sm:$0xff]  ;;  %v254_v31 = vld [vmem:[%s1032_s3 + $0x20] sm:$0xff]  ;;  %v255_v32 = vld [vmem:[%s1032_s3 + $0x28] sm:$0xff]  ;;  %p692_p1 = scmp.lt.s32.totalorder %s451_s15, %s451_s15 }
  0x1d   :  { %613 = vmatpush3.bf16.msra.mxu0 %v612_v13  ;;  %v649_v30 = vpack.c.bf16 %v253_v29, %v252_v28  ;;  %v652_v33 = vpack.c.bf16 %v255_v32, %v254_v31  ;;  %v256_v34 = vld [vmem:[%s1032_s3 + $0x30] sm:$0xff]  ;;  %v257_v35 = vld [vmem:[%s1032_s3 + $0x38] sm:$0xff]  ;;  %v258_v37 = vld [vmem:[%s1032_s3 + $0x40] sm:$0xff] }
  0x1e   :  { %638 = vmatpush1.bf16.msra.mxu1 %v637_v14  ;;  %615 = vmatprep.subr.bf16.mxu0 %v614_v16  ;;  %v655_v36 = vpack.c.bf16 %v257_v35, %v256_v34  ;;  %v259_v38 = vld [vmem:[%s1032_s3 + $0x48] sm:$0xff]  ;;  %v260_v40 = vld [vmem:[%s1032_s3 + $0x50] sm:$0xff]  ;;  %v261_v41 = vld [vmem:[%s1032_s3 + $0x58] sm:$0xff] }
  0x1f   :  { %639 = vmatprep.subr.bf16.mxu1 %v711_v4  ;;  %v658_v39 = vpack.c.bf16 %v259_v38, %v258_v37  ;;  %v661_v42 = vpack.c.bf16 %v261_v41, %v260_v40  ;;  %v262_v43 = vld [vmem:[%s1032_s3 + $0x60] sm:$0xff]  ;;  %v263_v44 = vld [vmem:[%s1032_s3 + $0x68] sm:$0xff]  ;;  %v264_v47 = vld [vmem:[%s1032_s3 + $0x70] sm:$0xff] }
  0x20   :  { %v664_v45 = vpack.c.bf16 %v263_v44, %v262_v43  ;;  %v347_v48 = vld [vmem:[%s1034_s5] sm:$0xff]  ;;  %v348_v49 = vld [vmem:[%s1034_s5 + $0x8] sm:$0xff]  ;;  %v349_v50 = vld [vmem:[%s1034_s5 + $0x10] sm:$0xff] }
  0x21   :  { %617 = vmatpush3.bf16.msra.mxu0 %v616_v20  ;;  %v667_v51 = vpack.c.bf16 %v348_v49, %v347_v48  ;;  %v350_v52 = vld [vmem:[%s1034_s5 + $0x18] sm:$0xff]  ;;  %v351_v54 = vld [vmem:[%s1034_s5 + $0x20] sm:$0xff]  ;;  %v352_v55 = vld [vmem:[%s1034_s5 + $0x28] sm:$0xff] }
  0x22   :  { %641 = vmatpush1.bf16.msra.mxu1 %v640_v21  ;;  %645 = vmatprep.subr.bf16.mxu0 %v711_v4  ;;  %v670_v53 = vpack.c.bf16 %v350_v52, %v349_v50  ;;  %v673_v56 = vpack.c.bf16 %v352_v55, %v351_v54  ;;  %v353_v57 = vld [vmem:[%s1034_s5 + $0x30] sm:$0xff]  ;;  %v354_v58 = vld [vmem:[%s1034_s5 + $0x38] sm:$0xff]  ;;  %v458_v62 = vld [vmem:[%s1031_s2] ss:$0 sm:$0xff] }
  0x23   :  { %642 = vmatprep.subr.bf16.mxu1 %v711_v4  ;;  %v676_v59 = vpack.c.bf16 %v354_v58, %v353_v57  ;;  %v355_v6 = vld [vmem:[%s1034_s5 + $0x40] sm:$0xff]  ;;  %v357_v8 = vld [vmem:[%s1034_s5 + $0x50] sm:$0xf] }
  0x24   :  { %174 = vmatmul.mubr.f32.vlgmr.msra.gmra.mrb[0].mxu0 %v93_v61  ;;  %v460_v9 = vld [vmem:[%s1033_s4] ss:$0 sm:$0xff] }
  0x25   :  { %647 = vmatpush3.bf16.msra.mxu0 %v646_v27  ;;  %558 = vmatprep.mubr.msk.f32.mxu0 %vm714_vm1, %v713_v46  ;;  %v462_v14 = vld [vmem:[%s1035_s6] ss:$0 sm:$0xff] }
  0x26   :  { %644 = vmatpush1.bf16.msra.mxu1 %v643_v26  ;;  %648 = vmatprep.subr.bf16.mxu0 %v711_v4 }
  0x27   :  { %666 = vmatprep.subr.bf16.mxu1 %v711_v4 }
  0x29   :  { %244 = vmatmul.mubr.f32.vlgmr.msra.gmra.mrb[0].mxu1 %v100_v1  ;;  %650 = vmatpush3.bf16.msra.mxu0 %v649_v30 }
  0x2a   :  { %651 = vmatprep.subr.bf16.mxu0 %v711_v4  ;;  %583 = vmatprep.mubr.msk.f32.mxu1 %vm714_vm1, %v713_v46 }
  0x2b   :  { %668 = vmatpush3.bf16.msra.mxu1 %v667_v51 }
  0x2c   :  { %669 = vmatprep.subr.bf16.mxu1 %v711_v4 }
  0x2d   :  { %653 = vmatpush3.bf16.msra.mxu0 %v652_v33 }
  0x2e   :  { %654 = vmatprep.subr.bf16.mxu0 %v711_v4 }
  0x2f   :  { %671 = vmatpush3.bf16.msra.mxu1 %v670_v53 }
  0x30   :  { %672 = vmatprep.subr.bf16.mxu1 %v711_v4 }
  0x31   :  { %656 = vmatpush3.bf16.msra.mxu0 %v655_v36 }
  0x32   :  { %657 = vmatprep.subr.bf16.mxu0 %v711_v4 }
  0x33   :  { %674 = vmatpush3.bf16.msra.mxu1 %v673_v56 }
  0x34   :  { %675 = vmatprep.subr.bf16.mxu1 %v711_v4 }
  0x35   :  { %659 = vmatpush3.bf16.msra.mxu0 %v658_v39 }
  0x36   :  { %660 = vmatprep.subr.bf16.mxu0 %v711_v4 }
  0x37   :  { %677 = vmatpush3.bf16.msra.mxu1 %v676_v59 }
  0x38   :  { %678 = vmatprep.subr.bf16.mxu1 %v711_v4 }
  0x39   :  { %662 = vmatpush3.bf16.msra.mxu0 %v661_v42 }
  0x3a   :  { %663 = vmatprep.subr.bf16.mxu0 %v711_v4  ;;  %v356_v4 = vld [vmem:[%s1034_s5 + $0x48] sm:$0xff]  ;;  %s687_s5 = scalar_lea.vmem %s451_s15, 32 }
  0x3b   :  { %v679_v7 = vpack.c.bf16 %v356_v4, %v355_v6  ;;  %p688_p0 = scmp.ne.s32.totalorder %s451_s15, %s687_s5  ;;  %p693_p2 = scmp.lt.s32.totalorder %s687_s5, %s687_s5 }
  0x3d   :  { %665 = vmatpush3.bf16.msra.mxu0 %v664_v45  ;;  %680 = vmatpush3.bf16.msra.mxu1 %v679_v7  ;;  %p694_p3 = por %p693_p2, %p692_p1 }
  0x3e   :  { %556 = vmatprep.subr.mxu0 %v713_v46  ;;  %581 = vmatprep.subr.mxu1 %v713_v46 }
  0x3f   :  { %p695_p4 = pnand %p694_p3, %p688_p0 }
  0x41   :  { %557 = vmatpush3.msra.mxu0 %v264_v47  ;;  %582 = vmatpush3.msk.msra.mxu1 %vm369_vm3, %v357_v8 }
  0xf7   :  { %v497_v60 = vpop.f32.mrb[0].mxu0 }
  0xf8   :  { %v498_v61 = vpop.f32.mrb[1].mxu0 }
  0xf9   :  { %v499_v63 = vadd.f32 %v498_v61, %v497_v60 }
  0xfb   :  { %v176_v0 = vadd.f32 %v499_v63, %v458_v62 }
  0xfc   :  { %v245_v1 = vpop.f32.mrb[0].mxu1 }
  0xfd   :  { %v247_v2 = vpop.f32.mrb[1].mxu1  ;;  %v246_v3 = vadd.f32 %v245_v1, %v176_v0 }
  0xff   :  { %v249_v5 = vmax.f32 %v246_v3, 0.0 }
 0x101   :  { %559 = vmatmul.mubr.msk.f32.vlgmr.msra.gmra.mrb[2].mxu0 %vm272_vm2, %v249_v5 }
 0x1d4   :  { %v342_v10 = vpop.f32.mrb[2].mxu0 }
 0x1d5   :  { %v343_v11 = vadd.f32 %v460_v9, %v342_v10  ;;  %v560_v12 = vpop.f32.mrb[3].mxu0 }
 0x1d7   :  { %v346_v13 = vmax.f32 %v343_v11, 0.0 }
 0x1d9   :  { %584 = vmatmul.mubr.msk.f32.vlgmr.msra.gmra.mrb[2].mxu1 %vm365_vm4, %v346_v13 }
 0x2ac   :  { %v439_v15 = vpop.f32.mrb[2].mxu1 }
 0x2ad   :  { %v440_v16 = vadd.f32 %v462_v14, %v439_v15  ;;  %v585_v17 = vpop.f32.mrb[3].mxu1 }
 0x2af   :  { %443 = vst [vmem:[#allocation2] sm:$0x3] %v440_v16 }
 0x2b0   :  { %698 = shalt.err (!%p695_p4)
}
 0x2b1   :  { %s699_s17 = scalar_lea.hbm %s1036_s7, 32 }
 0x2b2   :  { %p700_p5 = scmp.ne.s32.totalorder %s1036_s7, %s699_s17  ;;  %p703_p6 = scmp.lt.u32.totalorder %s699_s17, %s1036_s7 }
 0x2b4   :  { %p705_p7 = pnand %p703_p6, %p700_p5 }
 0x2b6   :  { %708 = shalt.err (!%p705_p7)
}
 0x2b7   :  { %453 = dma.vmem_to_hbm [thread:$0]  %s451_s15, 32, %s1036_s7, [#allocation3]  }
 0x2b8   :  { %709 = dma.done.wait [#allocation3], 32  }
 0x2b9   :  { %710 = vsyncadd [#allocation3], 4294967264 }
 0x2ba   :  { %457 = vsyncpa [#allocation3], 1 }

// kernel: lenet_fa_forward.3
= control target key start
LH: loop header
LB: loop body
LE: loop exit
PB: predicated region body
PF: predicated region fallthrough
CT: control target
= control target key end

     0   :  { %s1913_s24 = smov 0   ;;  %s2559_s0 = inlined_call_operand.vmem [shape: f32[2,32,96], index: 0, kind: input, shape index: {}]   ;;  %s2560_s1 = inlined_call_operand.vmem [shape: f32[5,96,168], index: 1, kind: input, shape index: {}]   ;;  %s2561_s2 = inlined_call_operand.vmem [shape: f32[1,168], index: 2, kind: input, shape index: {}]   ;;  %s2562_s3 = inlined_call_operand.vmem [shape: f32[168,84], index: 3, kind: input, shape index: {}]   ;;  %s2563_s4 = inlined_call_operand.vmem [shape: f32[168,84], index: 4, kind: input, shape index: {}]   ;;  %s2564_s5 = inlined_call_operand.vmem [shape: f32[14,28], index: 5, kind: input, shape index: {}]   ;;  %s2565_s6 = inlined_call_operand.vmem [shape: f32[14,28], index: 6, kind: input, shape index: {}]   ;;  %s2566_s7 = inlined_call_operand.vmem [shape: f32[2,14,84], index: 7, kind: output, shape index: {}]  }
   0x1 LB: > { %s1442_s25 = sadd.s32 4294967295, %s1868_s24   ;;  %p1446_p0 = scmp.ge.s32.totalorder %s1868_s24, 1  ;;  %s1868_s24 = sphi %s1913_s24, %s17_s24  }
   0x2   : > { %p237_p1 = scmp.lt.s32.totalorder %s1868_s24, 3 }
   0x4   : > { %p238_p2 = pnand %p1446_p0, %p237_p1 }
   0x5   : > { %v1452_v0 = vld [vmem:[%s2560_s1 + $0xc8] sm:$0xff] (!%p238_p2)  ;;  %v1454_v1 = vld [vmem:[%s2560_s1 + $0xd8] sm:$0xff] (!%p238_p2)  ;;  %v1451_v2 = vld [vmem:[%s2560_s1 + $0xc0] sm:$0xff] (!%p238_p2)  ;;  %v1870_v7 = vmov (!%p238_p2), 0.0   ;;  %v1871_v21 = vmov (!%p238_p2), 0.0|0.0   ;;  %p269_p3 = scmp.lt.s32.totalorder (!%p238_p2), %s1442_s25, 1 }
   0x6   : > { %241 = sbr.rel (%p238_p2) target bundleno = 844 (0x34c), region = 48  ;;  %v1619_v3 = vpack.c.bf16 (!%p238_p2), %v1454_v1, %v1452_v0  ;;  %v1453_v4 = vld [vmem:[%s2560_s1 + $0xd0] sm:$0xff] (!%p238_p2)  ;;  %v1456_v5 = vld [vmem:[%s2560_s1 + $0xe8] sm:$0xff] (!%p238_p2)  ;;  %v1458_v6 = vld [vmem:[%s2560_s1 + $0xf8] sm:$0xff] (!%p238_p2)  ;;  %413 = vmatprep.mubr.f32.mxu0 (!%p238_p2), %v1870_v7  ;;  %1739 = vmatprep.subr.bf16.mxu1 (!%p238_p2), %v1871_v21  ;;  %vm336_vm0 = vcmask (!%p238_p2), 785408   ;;  %vm1002_vm1 = vcmask (!%p238_p2), 326656  }
   0x7   : > { %v1621_v8 = vpack.c.bf16 (!%p238_p2), %v1453_v4, %v1451_v2  ;;  %v1623_v9 = vpack.c.bf16 (!%p238_p2), %v1458_v6, %v1456_v5  ;;  %v1455_v10 = vld [vmem:[%s2560_s1 + $0xe0] sm:$0xff] (!%p238_p2)  ;;  %v1457_v11 = vld [vmem:[%s2560_s1 + $0xf0] sm:$0xff] (!%p238_p2)  ;;  %v1460_v12 = vld [vmem:[%s2560_s1 + $0x108] sm:$0xff] (!%p238_p2)  ;;  %vm1212_vm2 = vcmask (!%p238_p2), 228352   ;;  %vm1219_vm3 = vcmask (!%p238_p2), 1043456  }
   0x8   : > { %1620 = vmatprep.subr.bf16.mxu0 (!%p238_p2), %v1619_v3  ;;  %v1462_v13 = vld [vmem:[%s2560_s1 + $0x118] sm:$0xff] (!%p238_p2)  ;;  %v1625_v14 = vpack.c.bf16 (!%p238_p2), %v1457_v11, %v1455_v10  ;;  %v1459_v16 = vld [vmem:[%s2560_s1 + $0x100] sm:$0xff] (!%p238_p2)  ;;  %v1461_v17 = vld [vmem:[%s2560_s1 + $0x110] sm:$0xff] (!%p238_p2)  ;;  %vm1872_vm4 = vmmov (!%p238_p2), 1   ;;  %vm1385_vm6 = vcmask (!%p238_p2), 685056   ;;  %vm1383_vm7 = vcmask (!%p238_p2), 687104  }
   0x9   : > { %1622 = vmatpush1.bf16.msra.mxu0 (!%p238_p2), %v1621_v8  ;;  %v1627_v15 = vpack.c.bf16 (!%p238_p2), %v1462_v13, %v1460_v12  ;;  %v1464_v18 = vld [vmem:[%s2560_s1 + $0x128] sm:$0xff] (!%p238_p2)  ;;  %v1466_v19 = vld [vmem:[%s2560_s1 + $0x138] sm:$0xff] (!%p238_p2)  ;;  %v1629_v20 = vpack.c.bf16 (!%p238_p2), %v1461_v17, %v1459_v16  ;;  %v1463_v23 = vld [vmem:[%s2560_s1 + $0x120] sm:$0xff] (!%p238_p2) }
   0xa   : > { %1624 = vmatprep.subr.bf16.mxu0 (!%p238_p2), %v1623_v9  ;;  %v1631_v22 = vpack.c.bf16 (!%p238_p2), %v1466_v19, %v1464_v18  ;;  %v1465_v24 = vld [vmem:[%s2560_s1 + $0x130] sm:$0xff] (!%p238_p2)  ;;  %v1468_v25 = vld [vmem:[%s2560_s1 + $0x148] sm:$0xff] (!%p238_p2)  ;;  %v1470_v26 = vld [vmem:[%s2560_s1 + $0x158] sm:$0xff] (!%p238_p2) }
   0xb   : > { %v1633_v27 = vpack.c.bf16 (!%p238_p2), %v1465_v24, %v1463_v23  ;;  %v1635_v28 = vpack.c.bf16 (!%p238_p2), %v1470_v26, %v1468_v25  ;;  %v1467_v29 = vld [vmem:[%s2560_s1 + $0x140] sm:$0xff] (!%p238_p2)  ;;  %v1469_v30 = vld [vmem:[%s2560_s1 + $0x150] sm:$0xff] (!%p238_p2)  ;;  %v1472_v31 = vld [vmem:[%s2560_s1 + $0x168] sm:$0xff] (!%p238_p2) }
   0xc   : > { %v1474_v32 = vld [vmem:[%s2560_s1 + $0x178] sm:$0xff] (!%p238_p2)  ;;  %v1637_v33 = vpack.c.bf16 (!%p238_p2), %v1469_v30, %v1467_v29  ;;  %v1471_v35 = vld [vmem:[%s2560_s1 + $0x160] sm:$0xff] (!%p238_p2)  ;;  %v1473_v36 = vld [vmem:[%s2560_s1 + $0x170] sm:$0xff] (!%p238_p2) }
   0xd   : > { %1626 = vmatpush1.bf16.msra.mxu0 %v1625_v14  ;;  %s2568_s25 = smov (!%p269_p3, %s1442_s25), 1  ;;  %v1639_v34 = vpack.c.bf16 %v1474_v32, %v1472_v31  ;;  %v284_v37 = vld [vmem:[%s2560_s1 + $0x8] sm:$0xff]  ;;  %v286_v38 = vld [vmem:[%s2560_s1 + $0x18] sm:$0xff]  ;;  %v1641_v39 = vpack.c.bf16 %v1473_v36, %v1471_v35  ;;  %v283_v41 = vld [vmem:[%s2560_s1] sm:$0xff] }
   0xe   : > { %1628 = vmatprep.subr.bf16.mxu0 %v1627_v15  ;;  %s1583_s13 = sshll.u32 %s2568_s25, 5  ;;  %v1643_v40 = vpack.c.bf16 %v286_v38, %v284_v37  ;;  %v285_v42 = vld [vmem:[%s2560_s1 + $0x10] sm:$0xff]  ;;  %v288_v43 = vld [vmem:[%s2560_s1 + $0x28] sm:$0xff]  ;;  %v290_v44 = vld [vmem:[%s2560_s1 + $0x38] sm:$0xff]  ;;  %s1584_s15 = sshll.u32 %s2568_s25, 4 }
   0xf   : > { %s2011_s16 = scalar_lea.vmem %s2559_s0, %s1583_s13  ;;  %v1645_v46 = vpack.c.bf16 %v285_v42, %v283_v41  ;;  %v1647_v47 = vpack.c.bf16 %v290_v44, %v288_v43  ;;  %v287_v48 = vld [vmem:[%s2560_s1 + $0x20] sm:$0xff]  ;;  %v289_v49 = vld [vmem:[%s2560_s1 + $0x30] sm:$0xff]  ;;  %v292_v50 = vld [vmem:[%s2560_s1 + $0x48] sm:$0xff]  ;;  %s278_s19 = scalar_lea.vmem %s2566_s7, %s1584_s15 }
  0x10   : > { %v307_v45 = vld [vmem:[%s2011_s16 + $0x1] sm:$0xff]  ;;  %v294_v51 = vld [vmem:[%s2560_s1 + $0x58] sm:$0xff]  ;;  %v1649_v52 = vpack.c.bf16 %v289_v49, %v287_v48  ;;  %v308_v53 = vld [vmem:[%s2011_s16 + $0x9] sm:$0xff] }
  0x11   : > { %1630 = vmatpush1.bf16.msra.mxu0 %v1629_v20  ;;  %v1651_v54 = vpack.c.bf16 %v294_v51, %v292_v50  ;;  %v291_v55 = vld [vmem:[%s2560_s1 + $0x40] sm:$0xff]  ;;  %v293_v56 = vld [vmem:[%s2560_s1 + $0x50] sm:$0xff]  ;;  %v296_v57 = vld [vmem:[%s2560_s1 + $0x68] sm:$0xff] }
  0x12   : > { %1632 = vmatprep.subr.bf16.mxu0 %v1631_v22  ;;  %v298_v58 = vld [vmem:[%s2560_s1 + $0x78] sm:$0xff]  ;;  %v1653_v59 = vpack.c.bf16 %v293_v56, %v291_v55  ;;  %v295_v62 = vld [vmem:[%s2560_s1 + $0x60] sm:$0xff]  ;;  %v297_v63 = vld [vmem:[%s2560_s1 + $0x70] sm:$0xff] }
  0x13   : > { %v309_v60 = vld [vmem:[%s2011_s16 + $0x11] sm:$0xff]  ;;  %v1655_v61 = vpack.c.bf16 %v298_v58, %v296_v57  ;;  %v300_v0 = vld [vmem:[%s2560_s1 + $0x88] sm:$0xff]  ;;  %v1657_v2 = vpack.c.bf16 %v297_v63, %v295_v62  ;;  %v310_v3 = vld [vmem:[%s2011_s16 + $0x19] sm:$0xf] }
  0x14   : > { %v302_v1 = vld [vmem:[%s2560_s1 + $0x98] sm:$0xff]  ;;  %v299_v5 = vld [vmem:[%s2560_s1 + $0x80] sm:$0xff]  ;;  %v301_v6 = vld [vmem:[%s2560_s1 + $0x90] sm:$0xff] }
  0x15   : > { %1634 = vmatpush1.bf16.msra.mxu0 %v1633_v27  ;;  %v1659_v4 = vpack.c.bf16 %v302_v1, %v300_v0  ;;  %v304_v8 = vld [vmem:[%s2560_s1 + $0xa8] sm:$0xff]  ;;  %v306_v9 = vld [vmem:[%s2560_s1 + $0xb8] sm:$0xff]  ;;  %v1661_v10 = vpack.c.bf16 %v301_v6, %v299_v5  ;;  %v303_v12 = vld [vmem:[%s2560_s1 + $0xa0] sm:$0xff] }
  0x16   : > { %1636 = vmatprep.subr.bf16.mxu0 %v1635_v28  ;;  %v1663_v11 = vpack.c.bf16 %v306_v9, %v304_v8  ;;  %v305_v13 = vld [vmem:[%s2560_s1 + $0xb0] sm:$0xff]  ;;  %v1484_v14 = vld [vmem:[%s2560_s1 + $0x188] sm:$0xff]  ;;  %v1486_v15 = vld [vmem:[%s2560_s1 + $0x198] sm:$0xff] }
  0x17   : > { %v1665_v16 = vpack.c.bf16 %v305_v13, %v303_v12  ;;  %v1667_v17 = vpack.c.bf16 %v1486_v15, %v1484_v14  ;;  %v1483_v18 = vld [vmem:[%s2560_s1 + $0x180] sm:$0xff]  ;;  %v1485_v19 = vld [vmem:[%s2560_s1 + $0x190] sm:$0xff]  ;;  %v1488_v20 = vld [vmem:[%s2560_s1 + $0x1a8] sm:$0xff] }
  0x18   : > { %v1490_v22 = vld [vmem:[%s2560_s1 + $0x1b8] sm:$0xff]  ;;  %v981_v23 = vld [vmem:[%s2562_s3] sm:$0xff]  ;;  %v982_v24 = vld [vmem:[%s2562_s3 + $0x8] sm:$0xff]  ;;  %v1669_v28 = vpack.c.bf16 %v1485_v19, %v1483_v18 }
  0x19   : > { %1638 = vmatpush1.bf16.msra.mxu0 %v1637_v33  ;;  %v983_v25 = vld [vmem:[%s2562_s3 + $0x10] sm:$0xff]  ;;  %v984_v26 = vld [vmem:[%s2562_s3 + $0x18] sm:$0xff]  ;;  %v279_v27 = vld [vmem:[%s2011_s16] sm:$0xff]  ;;  %v1740_v29 = vpack.c.bf16 %v982_v24, %v981_v23  ;;  %v1671_v30 = vpack.c.bf16 %v1490_v22, %v1488_v20 }
  0x1a   : > { %1640 = vmatprep.subr.bf16.mxu0 %v1639_v34  ;;  %v1487_v31 = vld [vmem:[%s2560_s1 + $0x1a0] sm:$0xff]  ;;  %v1489_v32 = vld [vmem:[%s2560_s1 + $0x1b0] sm:$0xff]  ;;  %v1492_v33 = vld [vmem:[%s2560_s1 + $0x1c8] sm:$0xff]  ;;  %v1743_v35 = vpack.c.bf16 %v984_v26, %v983_v25 }
  0x1b   : > { %v1494_v34 = vld [vmem:[%s2560_s1 + $0x1d8] sm:$0xff]  ;;  %1741 = vmatpush1.bf16.msra.mxu1 %v1740_v29  ;;  %v985_v36 = vld [vmem:[%s2562_s3 + $0x20] sm:$0xff]  ;;  %v986_v37 = vld [vmem:[%s2562_s3 + $0x28] sm:$0xff]  ;;  %v1673_v38 = vpack.c.bf16 %v1489_v32, %v1487_v31 }
  0x1c   : > { %1742 = vmatprep.subr.bf16.mxu1 %v1871_v21  ;;  %v1491_v41 = vld [vmem:[%s2560_s1 + $0x1c0] sm:$0xff]  ;;  %v1493_v42 = vld [vmem:[%s2560_s1 + $0x1d0] sm:$0xff]  ;;  %v1496_v43 = vld [vmem:[%s2560_s1 + $0x1e8] sm:$0xff] }
  0x1d   : > { %1642 = vmatpush1.bf16.msra.mxu0 %v1641_v39  ;;  %v280_v39 = vld [vmem:[%s2011_s16 + $0x8] sm:$0xff]  ;;  %v1498_v44 = vld [vmem:[%s2560_s1 + $0x1f8] sm:$0xff]  ;;  %v1677_v48 = vpack.c.bf16 %v1493_v42, %v1491_v41  ;;  %v281_v49 = vld [vmem:[%s2011_s16 + $0x10] sm:$0xff] }
  0x1e   : > { %1644 = vmatprep.subr.bf16.mxu0 %v1643_v40  ;;  %v1675_v40 = vpack.c.bf16 %v1494_v34, %v1492_v33  ;;  %v1679_v50 = vpack.c.bf16 %v1498_v44, %v1496_v43  ;;  %v1495_v51 = vld [vmem:[%s2560_s1 + $0x1e0] sm:$0xff]  ;;  %v990_v57 = vld [vmem:[%s2562_s3 + $0x48] sm:$0xff]  ;;  %v1501_v62 = vld [vmem:[%s2560_s1 + $0x210] sm:$0xff] }
  0x1f   : > { %1744 = vmatpush1.bf16.msra.mxu1 %v1743_v35  ;;  %v989_v56 = vld [vmem:[%s2562_s3 + $0x40] sm:$0xff]  ;;  %v1504_v63 = vld [vmem:[%s2560_s1 + $0x228] sm:$0xff]  ;;  %v1506_v0 = vld [vmem:[%s2560_s1 + $0x238] sm:$0xff] }
  0x20   : > { %1475 = vmatmul.mubr.msk.f32.vlgmr.msra.gmra.mrb[0].mxu0 %vm336_vm0, %v307_v45  ;;  %v1746_v45 = vpack.c.bf16 %v986_v37, %v985_v36  ;;  %1745 = vmatprep.subr.bf16.mxu1 %v1871_v21  ;;  %v1752_v1 = vpack.c.bf16 %v990_v57, %v989_v56  ;;  %v1687_v5 = vpack.c.bf16 %v1506_v0, %v1504_v63  ;;  %v1503_v6 = vld [vmem:[%s2560_s1 + $0x220] sm:$0xff]  ;;  %v1505_v8 = vld [vmem:[%s2560_s1 + $0x230] sm:$0xff]  ;;  %v1512_v9 = vld [vmem:[%s2560_s1 + $0x248] sm:$0xff] }
  0x21   : > { %1646 = vmatpush1.bf16.msra.mxu0 %v1645_v46  ;;  %419 = vmatprep.mubr.f32.mxu0 %v1870_v7  ;;  %v987_v46 = vld [vmem:[%s2562_s3 + $0x30] sm:$0xff]  ;;  %v993_v12 = vld [vmem:[%s2562_s3 + $0x60] sm:$0xff]  ;;  %v994_v13 = vld [vmem:[%s2562_s3 + $0x68] sm:$0xff]  ;;  %v1689_v14 = vpack.c.bf16 %v1505_v8, %v1503_v6 }
  0x22   : > { %1648 = vmatprep.subr.bf16.mxu0 %v1647_v47  ;;  %v988_v47 = vld [vmem:[%s2562_s3 + $0x38] sm:$0xff]  ;;  %v1516_v18 = vld [vmem:[%s2560_s1 + $0x268] sm:$0xff]  ;;  %v1758_v20 = vpack.c.bf16 %v994_v13, %v993_v12  ;;  %v995_v22 = vld [vmem:[%s2562_s3 + $0x70] sm:$0xff] }
  0x23   : > { %1747 = vmatpush1.bf16.msra.mxu1 %v1746_v45  ;;  %v1749_v55 = vpack.c.bf16 %v988_v47, %v987_v46  ;;  %v1518_v19 = vld [vmem:[%s2560_s1 + $0x278] sm:$0xff]  ;;  %v539_v24 = vld [vmem:[%s2011_s16 + $0x2] sm:$0xff]  ;;  %v540_v35 = vld [vmem:[%s2011_s16 + $0xa] sm:$0xff] }
  0x24   : > { %1476 = vmatmul.mubr.msk.f32.gmra.mrb[2].mxu0 %vm336_vm0, %v308_v53  ;;  %v1500_v53 = vld [vmem:[%s2560_s1 + $0x208] sm:$0xff]  ;;  %1748 = vmatprep.subr.bf16.mxu1 %v1871_v21  ;;  %v996_v23 = vld [vmem:[%s2562_s3 + $0x78] sm:$0xff]  ;;  %v1695_v26 = vpack.c.bf16 %v1518_v19, %v1516_v18  ;;  %v997_v32 = vld [vmem:[%s2562_s3 + $0x80] sm:$0xff] }
  0x25   : > { %1650 = vmatpush1.bf16.msra.mxu0 %v1649_v52  ;;  %425 = vmatprep.mubr.f32.mxu0 %v1870_v7  ;;  %v1497_v52 = vld [vmem:[%s2560_s1 + $0x1f0] sm:$0xff]  ;;  %v1520_v29 = vld [vmem:[%s2560_s1 + $0x288] sm:$0xff]  ;;  %v1761_v31 = vpack.c.bf16 %v996_v23, %v995_v22  ;;  %v1519_v37 = vld [vmem:[%s2560_s1 + $0x280] sm:$0xff] }
  0x26   : > { %1652 = vmatprep.subr.bf16.mxu0 %v1651_v54  ;;  %v1502_v54 = vld [vmem:[%s2560_s1 + $0x218] sm:$0xff]  ;;  %v1681_v58 = vpack.c.bf16 %v1497_v52, %v1495_v51  ;;  %v998_v33 = vld [vmem:[%s2562_s3 + $0x88] sm:$0xff]  ;;  %v1523_v45 = vld [vmem:[%s2560_s1 + $0x2a0] sm:$0xff] }
  0x27   : > { %1750 = vmatpush1.bf16.msra.mxu1 %v1749_v55  ;;  %v1764_v41 = vpack.c.bf16 %v998_v33, %v997_v32  ;;  %v541_v43 = vld [vmem:[%s2011_s16 + $0x12] sm:$0xff]  ;;  %v1528_v47 = vld [vmem:[%s2560_s1 + $0x2c8] sm:$0xff]  ;;  %v1527_v52 = vld [vmem:[%s2560_s1 + $0x2c0] sm:$0xff] }
  0x28   : > { %1477 = vmatmul.mubr.msk.f32.gmra.mrb[4].mxu0 %vm336_vm0, %v309_v60  ;;  %v1683_v60 = vpack.c.bf16 %v1502_v54, %v1500_v53  ;;  %1751 = vmatprep.subr.bf16.mxu1 %v1871_v21  ;;  %v1525_v46 = vld [vmem:[%s2560_s1 + $0x2b0] sm:$0xff]  ;;  %v1532_v54 = vld [vmem:[%s2560_s1 + $0x2e8] sm:$0xff]  ;;  %v1534_v55 = vld [vmem:[%s2560_s1 + $0x2f8] sm:$0xff] }
  0x29   : > { %1654 = vmatpush1.bf16.msra.mxu0 %v1653_v59  ;;  %431 = vmatprep.mubr.f32.mxu0 %v1870_v7  ;;  %v282_v59 = vld [vmem:[%s2011_s16 + $0x18] sm:$0xf]  ;;  %v1529_v53 = vld [vmem:[%s2560_s1 + $0x2d0] sm:$0xff]  ;;  %v1711_v57 = vpack.c.bf16 %v1534_v55, %v1532_v54  ;;  %v1539_v0 = vld [vmem:[%s2560_s1 + $0x300] sm:$0xff] }
  0x2a   : > { %1656 = vmatprep.subr.bf16.mxu0 %v1655_v61  ;;  %v1499_v61 = vld [vmem:[%s2560_s1 + $0x200] sm:$0xff]  ;;  %v1709_v56 = vpack.c.bf16 %v1529_v53, %v1527_v52  ;;  %v678_v13 = vld [vmem:[%s2011_s16 + $0xb] sm:$0xff]  ;;  %v1554_v18 = vld [vmem:[%s2560_s1 + $0x378] sm:$0xff] }
  0x2b   : > { %1753 = vmatpush1.bf16.msra.mxu1 %v1752_v1  ;;  %v1541_v1 = vld [vmem:[%s2560_s1 + $0x310] sm:$0xff]  ;;  %v1543_v8 = vld [vmem:[%s2560_s1 + $0x320] sm:$0xff]  ;;  %v1560_v32 = vld [vmem:[%s2560_s1 + $0x3a8] sm:$0xff] }
  0x2c   : > { %1478 = vmatmul.mubr.msk.f32.gmra.mrb[6].mxu0 %vm336_vm0, %v310_v3  ;;  %v992_v3 = vld [vmem:[%s2562_s3 + $0x58] sm:$0xff]  ;;  %1754 = vmatprep.subr.bf16.mxu1 %v1871_v21  ;;  %v1551_v23 = vld [vmem:[%s2560_s1 + $0x360] sm:$0xff]  ;;  %vm1804_vm5 = vmpackc.low %vm1219_vm3, %vm1872_vm4 }
  0x2d   : > { %1658 = vmatpush1.bf16.msra.mxu0 %v1657_v2  ;;  %514 = vmatprep.mubr.f32.mxu0 %v1870_v7  ;;  %v991_v2 = vld [vmem:[%s2562_s3 + $0x50] sm:$0xff]  ;;  %v1562_v33 = vld [vmem:[%s2560_s1 + $0x3b8] sm:$0xff] }
  0x2e   : > { %1660 = vmatprep.subr.bf16.mxu0 %v1659_v4  ;;  %v1685_v4 = vpack.c.bf16 %v1501_v62, %v1499_v61  ;;  %v1542_v61 = vld [vmem:[%s2560_s1 + $0x318] sm:$0xff] }
  0x31   : > { %1662 = vmatpush1.bf16.msra.mxu0 %v1661_v10  ;;  %v1514_v10 = vld [vmem:[%s2560_s1 + $0x258] sm:$0xff] }
  0x32   : > { %1664 = vmatprep.subr.bf16.mxu0 %v1663_v11  ;;  %v1755_v11 = vpack.c.bf16 %v992_v3, %v991_v2  ;;  %v1691_v15 = vpack.c.bf16 %v1514_v10, %v1512_v9  ;;  %v1544_v2 = vld [vmem:[%s2560_s1 + $0x328] sm:$0xff]  ;;  %v1546_v3 = vld [vmem:[%s2560_s1 + $0x338] sm:$0xff]  ;;  %v1545_v9 = vld [vmem:[%s2560_s1 + $0x330] sm:$0xff] }
  0x33   : > { %v1719_v6 = vpack.c.bf16 %v1546_v3, %v1544_v2  ;;  %v1548_v10 = vld [vmem:[%s2560_s1 + $0x348] sm:$0xff]  ;;  %v1721_v12 = vpack.c.bf16 %v1545_v9, %v1543_v8  ;;  %v1102_v2 = vld [vmem:[%s2563_s4 + $0x10] sm:$0xff]  ;;  %v1103_v3 = vld [vmem:[%s2563_s4 + $0x18] sm:$0xff] }
  0x34   : > { %1756 = vmatpush1.bf16.msra.mxu1 %v1755_v11  ;;  %v1550_v11 = vld [vmem:[%s2560_s1 + $0x358] sm:$0xff]  ;;  %v1773_v8 = vpack.c.bf16 %v1103_v3, %v1102_v2 }
  0x35   : > { %1666 = vmatpush1.bf16.msra.mxu0 %v1665_v16  ;;  %v1511_v16 = vld [vmem:[%s2560_s1 + $0x240] sm:$0xff]  ;;  %1757 = vmatprep.subr.bf16.mxu1 %v1871_v21 }
  0x36   : > { %1668 = vmatprep.subr.bf16.mxu0 %v1667_v17  ;;  %v1513_v17 = vld [vmem:[%s2560_s1 + $0x250] sm:$0xff] }
  0x37   : > { %v1693_v25 = vpack.c.bf16 %v1513_v17, %v1511_v16  ;;  %v1549_v16 = vld [vmem:[%s2560_s1 + $0x350] sm:$0xff]  ;;  %v1552_v17 = vld [vmem:[%s2560_s1 + $0x368] sm:$0xff] }
  0x38   : > { %1479 = vmatmul.mubr.msk.f32.vlgmr.msra.gmra.mrb[0].mxu0 %vm336_vm0, %v279_v27  ;;  %v1515_v27 = vld [vmem:[%s2560_s1 + $0x260] sm:$0xff]  ;;  %1759 = vmatpush1.bf16.msra.mxu1 %v1758_v20  ;;  %v679_v20 = vld [vmem:[%s2011_s16 + $0x13] sm:$0xff]  ;;  %v1727_v22 = vpack.c.bf16 %v1554_v18, %v1552_v17 }
  0x39   : > { %1670 = vmatpush1.bf16.msra.mxu0 %v1669_v28  ;;  %520 = vmatprep.mubr.f32.mxu0 %v1870_v7  ;;  %v1517_v28 = vld [vmem:[%s2560_s1 + $0x270] sm:$0xff] }
  0x3a   : > { %1672 = vmatprep.subr.bf16.mxu0 %v1671_v30  ;;  %v1522_v30 = vld [vmem:[%s2560_s1 + $0x298] sm:$0xff]  ;;  %1760 = vmatprep.subr.bf16.mxu1 %v1871_v21  ;;  %v1697_v34 = vpack.c.bf16 %v1517_v28, %v1515_v27 }
  0x3b   : > { %v1699_v36 = vpack.c.bf16 %v1522_v30, %v1520_v29  ;;  %v680_v28 = vld [vmem:[%s2011_s16 + $0x1b] sm:$0xf]  ;;  %v1555_v30 = vld [vmem:[%s2560_s1 + $0x380] sm:$0xff] }
  0x3c   : > { %1480 = vmatmul.mubr.msk.f32.gmra.mrb[2].mxu0 %vm336_vm0, %v280_v39  ;;  %v1524_v39 = vld [vmem:[%s2560_s1 + $0x2a8] sm:$0xff]  ;;  %1762 = vmatpush1.bf16.msra.mxu1 %v1761_v31  ;;  %v1557_v31 = vld [vmem:[%s2560_s1 + $0x390] sm:$0xff] }
  0x3d   : > { %1674 = vmatpush1.bf16.msra.mxu0 %v1673_v38  ;;  %526 = vmatprep.mubr.f32.mxu0 %v1870_v7  ;;  %v1521_v38 = vld [vmem:[%s2560_s1 + $0x290] sm:$0xff] }
  0x3e   : > { %1676 = vmatprep.subr.bf16.mxu0 %v1675_v40  ;;  %v1526_v40 = vld [vmem:[%s2560_s1 + $0x2b8] sm:$0xff]  ;;  %1763 = vmatprep.subr.bf16.mxu1 %v1871_v21  ;;  %v1701_v42 = vpack.c.bf16 %v1521_v38, %v1519_v37  ;;  %v1561_v37 = vld [vmem:[%s2560_s1 + $0x3b0] sm:$0xff] }
  0x3f   : > { %v1703_v44 = vpack.c.bf16 %v1526_v40, %v1524_v39  ;;  %v815_v39 = vld [vmem:[%s2011_s16 + $0x4] sm:$0xff]  ;;  %v816_v40 = vld [vmem:[%s2011_s16 + $0xc] sm:$0xff] }
  0x40   : > { %1481 = vmatmul.mubr.msk.f32.gmra.mrb[4].mxu0 %vm336_vm0, %v281_v49  ;;  %1765 = vmatpush1.bf16.msra.mxu1 %v1764_v41  ;;  %v1705_v49 = vpack.c.bf16 %v1525_v46, %v1523_v45  ;;  %v817_v41 = vld [vmem:[%s2011_s16 + $0x14] sm:$0xff]  ;;  %v1001_v46 = vld [vmem:[%s2562_s3 + $0xa0] sm:$0xff] }
  0x41   : > { %1678 = vmatpush1.bf16.msra.mxu0 %v1677_v48  ;;  %532 = vmatprep.mubr.f32.mxu0 %v1870_v7  ;;  %v1530_v48 = vld [vmem:[%s2560_s1 + $0x2d8] sm:$0xff] }
  0x42   : > { %1680 = vmatprep.subr.bf16.mxu0 %v1679_v50  ;;  %1766 = vmatprep.subr.bf16.mxu1 %v1871_v21  ;;  %v542_v50 = vld [vmem:[%s2011_s16 + $0x1a] sm:$0xf]  ;;  %v1707_v51 = vpack.c.bf16 %v1530_v48, %v1528_v47  ;;  %v955_v47 = vlaneseq }
  0x44   : > { %1482 = vmatmul.mubr.msk.f32.gmra.mrb[6].mxu0 %vm336_vm0, %v282_v59  ;;  %v1533_v59 = vld [vmem:[%s2560_s1 + $0x2f0] sm:$0xff]  ;;  %v956_v48 = vshrl.u32 %v955_v47, 7 }
  0x45   : > { %1682 = vmatpush1.bf16.msra.mxu0 %v1681_v58  ;;  %644 = vmatprep.mubr.f32.mxu0 %v1870_v7  ;;  %v1531_v58 = vld [vmem:[%s2560_s1 + $0x2e0] sm:$0xff] }
  0x46   : > { %1684 = vmatprep.subr.bf16.mxu0 %v1683_v60  ;;  %v1540_v60 = vld [vmem:[%s2560_s1 + $0x308] sm:$0xff]  ;;  %v1713_v62 = vpack.c.bf16 %v1533_v59, %v1531_v58 }
  0x47   : > { %v1715_v63 = vpack.c.bf16 %v1542_v61, %v1540_v60  ;;  %v1101_v58 = vld [vmem:[%s2563_s4 + $0x8] sm:$0xff] }
  0x49   : > { %1686 = vmatpush1.bf16.msra.mxu0 %v1685_v4  ;;  %v677_v4 = vld [vmem:[%s2011_s16 + $0x3] sm:$0xff] }
  0x4a   : > { %1688 = vmatprep.subr.bf16.mxu0 %v1687_v5  ;;  %v1717_v5 = vpack.c.bf16 %v1541_v1, %v1539_v0 }
  0x4d   : > { %1690 = vmatpush1.bf16.msra.mxu0 %v1689_v14  ;;  %v1723_v14 = vpack.c.bf16 %v1550_v11, %v1548_v10 }
  0x4e   : > { %1692 = vmatprep.subr.bf16.mxu0 %v1691_v15  ;;  %v1547_v15 = vld [vmem:[%s2560_s1 + $0x340] sm:$0xff] }
  0x4f   : > { %v1725_v19 = vpack.c.bf16 %v1549_v16, %v1547_v15 }
  0x50   : > { %1507 = vmatmul.mubr.msk.f32.vlgmr.msra.gmra.mrb[0].mxu0 %vm336_vm0, %v539_v24  ;;  %v1553_v24 = vld [vmem:[%s2560_s1 + $0x370] sm:$0xff] }
  0x51   : > { %1694 = vmatpush1.bf16.msra.mxu0 %v1693_v25  ;;  %650 = vmatprep.mubr.f32.mxu0 %v1870_v7  ;;  %v1556_v25 = vld [vmem:[%s2560_s1 + $0x388] sm:$0xff]  ;;  %v1729_v27 = vpack.c.bf16 %v1553_v24, %v1551_v23  ;;  %v1107_v23 = vld [vmem:[%s2563_s4 + $0x38] sm:$0xff] }
  0x52   : > { %1696 = vmatprep.subr.bf16.mxu0 %v1695_v26  ;;  %v1558_v26 = vld [vmem:[%s2560_s1 + $0x398] sm:$0xff] }
  0x53   : > { %v1731_v29 = vpack.c.bf16 %v1558_v26, %v1556_v25 }
  0x54   : > { %1508 = vmatmul.mubr.msk.f32.gmra.mrb[2].mxu0 %vm336_vm0, %v540_v35  ;;  %v1735_v35 = vpack.c.bf16 %v1562_v33, %v1560_v32  ;;  %v1111_v32 = vld [vmem:[%s2563_s4 + $0x58] sm:$0xff] }
  0x55   : > { %1698 = vmatpush1.bf16.msra.mxu0 %v1697_v34  ;;  %656 = vmatprep.mubr.f32.mxu0 %v1870_v7  ;;  %v1733_v34 = vpack.c.bf16 %v1557_v31, %v1555_v30  ;;  %v1110_v31 = vld [vmem:[%s2563_s4 + $0x50] sm:$0xff] }
  0x56   : > { %1700 = vmatprep.subr.bf16.mxu0 %v1699_v36  ;;  %v1559_v36 = vld [vmem:[%s2560_s1 + $0x3a0] sm:$0xff]  ;;  %v1785_v33 = vpack.c.bf16 %v1111_v32, %v1110_v31 }
  0x57   : > { %v1737_v38 = vpack.c.bf16 %v1561_v37, %v1559_v36  ;;  %v1114_v37 = vld [vmem:[%s2563_s4 + $0x70] sm:$0xff] }
  0x58   : > { %1509 = vmatmul.mubr.msk.f32.gmra.mrb[4].mxu0 %vm336_vm0, %v541_v43  ;;  %v999_v43 = vld [vmem:[%s2562_s3 + $0x90] sm:$0xff] }
  0x59   : > { %1702 = vmatpush1.bf16.msra.mxu0 %v1701_v42  ;;  %662 = vmatprep.mubr.f32.mxu0 %v1870_v7  ;;  %v818_v42 = vld [vmem:[%s2011_s16 + $0x1c] sm:$0xf] }
  0x5a   : > { %1704 = vmatprep.subr.bf16.mxu0 %v1703_v44  ;;  %v1000_v44 = vld [vmem:[%s2562_s3 + $0x98] sm:$0xff] }
  0x5b   : > { %v1767_v45 = vpack.c.bf16 %v1000_v44, %v999_v43  ;;  %v1118_v43 = vld [vmem:[%s2563_s4 + $0x90] sm:$0xff]  ;;  %v1119_v44 = vld [vmem:[%s2563_s4 + $0x98] sm:$0xff] }
  0x5c   : > { %1510 = vmatmul.mubr.msk.f32.gmra.mrb[6].mxu0 %vm336_vm0, %v542_v50  ;;  %v953_v50 = vld [vmem:[%s2561_s2] sm:$0x3] }
  0x5d   : > { %1706 = vmatpush1.bf16.msra.mxu0 %v1705_v49  ;;  %782 = vmatprep.mubr.f32.mxu0 %v1870_v7  ;;  %v957_v49 = vsub.s32 0, %v956_v48 }
  0x5e   : > { %1708 = vmatprep.subr.bf16.mxu0 %v1707_v51  ;;  %1768 = vmatpush1.bf16.msra.mxu1 %v1767_v45  ;;  %v961_v51 = vsub.s32 1, %v956_v48  ;;  %v1797_v45 = vpack.c.bf16 %v1119_v44, %v1118_v43 }
  0x5f   : > { %1055 = vmatprep.subr.mxu1 %v1870_v7  ;;  %v958_v52 = vrot.slane %v953_v50, %v957_v49 }
  0x60   : > { %v962_v53 = vrot.slane %v953_v50, %v961_v51 }
  0x61   : > { %1710 = vmatpush1.bf16.msra.mxu0 %v1709_v56 }
  0x62   : > { %1712 = vmatprep.subr.bf16.mxu0 %v1711_v57  ;;  %1056 = vmatpush1.msra.mxu1 %v1001_v46  ;;  %v1100_v57 = vld [vmem:[%s2563_s4] sm:$0xff] }
  0x63   : > { %1769 = vmatprep.subr.bf16.mxu1 %v1871_v21  ;;  %v1120_v46 = vld [vmem:[%s2563_s4 + $0xa0] sm:$0xff] }
  0x65   : > { %1714 = vmatpush1.bf16.msra.mxu0 %v1713_v62  ;;  %v1770_v62 = vpack.c.bf16 %v1101_v58, %v1100_v57 }
  0x66   : > { %1716 = vmatprep.subr.bf16.mxu0 %v1715_v63 }
  0x68   : > { %1535 = vmatmul.mubr.msk.f32.vlgmr.msra.gmra.mrb[0].mxu0 %vm336_vm0, %v677_v4 }
  0x69   : > { %1718 = vmatpush1.bf16.msra.mxu0 %v1717_v5  ;;  %788 = vmatprep.mubr.f32.mxu0 %v1870_v7 }
  0x6a   : > { %1720 = vmatprep.subr.bf16.mxu0 %v1719_v6 }
  0x6c   : > { %1536 = vmatmul.mubr.msk.f32.gmra.mrb[2].mxu0 %vm336_vm0, %v678_v13  ;;  %v1105_v13 = vld [vmem:[%s2563_s4 + $0x28] sm:$0xff] }
  0x6d   : > { %1722 = vmatpush1.bf16.msra.mxu0 %v1721_v12  ;;  %794 = vmatprep.mubr.f32.mxu0 %v1870_v7  ;;  %v1104_v12 = vld [vmem:[%s2563_s4 + $0x20] sm:$0xff] }
  0x6e   : > { %1724 = vmatprep.subr.bf16.mxu0 %v1723_v14  ;;  %v1776_v17 = vpack.c.bf16 %v1105_v13, %v1104_v12 }
  0x70   : > { %1537 = vmatmul.mubr.msk.f32.gmra.mrb[4].mxu0 %vm336_vm0, %v679_v20 }
  0x71   : > { %1726 = vmatpush1.bf16.msra.mxu0 %v1725_v19  ;;  %800 = vmatprep.mubr.f32.mxu0 %v1870_v7 }
  0x72   : > { %1728 = vmatprep.subr.bf16.mxu0 %v1727_v22  ;;  %v1106_v22 = vld [vmem:[%s2563_s4 + $0x30] sm:$0xff] }
  0x73   : > { %v1779_v26 = vpack.c.bf16 %v1107_v23, %v1106_v22 }
  0x74   : > { %1538 = vmatmul.mubr.msk.f32.gmra.mrb[6].mxu0 %vm336_vm0, %v680_v28  ;;  %v1108_v28 = vld [vmem:[%s2563_s4 + $0x40] sm:$0xff] }
  0x75   : > { %1730 = vmatpush1.bf16.msra.mxu0 %v1729_v27  ;;  %920 = vmatprep.mubr.f32.mxu0 %v1870_v7 }
  0x76   : > { %1732 = vmatprep.subr.bf16.mxu0 %v1731_v29  ;;  %v1109_v29 = vld [vmem:[%s2563_s4 + $0x48] sm:$0xff] }
  0x77   : > { %v1782_v30 = vpack.c.bf16 %v1109_v29, %v1108_v28 }
  0x79   : > { %1734 = vmatpush1.bf16.msra.mxu0 %v1733_v34  ;;  %v1112_v34 = vld [vmem:[%s2563_s4 + $0x60] sm:$0xff] }
  0x7a   : > { %1736 = vmatprep.subr.bf16.mxu0 %v1735_v35  ;;  %v1113_v35 = vld [vmem:[%s2563_s4 + $0x68] sm:$0xff] }
  0x7b   : > { %v1788_v36 = vpack.c.bf16 %v1113_v35, %v1112_v34 }
  0x7d   : > { %1738 = vmatpush1.bf16.msra.mxu0 %v1737_v38  ;;  %v1115_v38 = vld [vmem:[%s2563_s4 + $0x78] sm:$0xff] }
  0x80   : > { %1563 = vmatmul.mubr.msk.f32.vlgmr.msra.gmra.mrb[0].mxu0 %vm336_vm0, %v815_v39  ;;  %v1791_v39 = vpack.c.bf16 %v1115_v38, %v1114_v37 }
  0x81   : > { %926 = vmatprep.mubr.f32.mxu0 %v1870_v7 }
  0x84   : > { %1564 = vmatmul.mubr.msk.f32.gmra.mrb[2].mxu0 %vm336_vm0, %v816_v40  ;;  %v1116_v40 = vld [vmem:[%s2563_s4 + $0x80] sm:$0xff] }
  0x85   : > { %932 = vmatprep.mubr.f32.mxu0 %v1870_v7 }
  0x88   : > { %1565 = vmatmul.mubr.msk.f32.gmra.mrb[4].mxu0 %vm336_vm0, %v817_v41  ;;  %v1117_v41 = vld [vmem:[%s2563_s4 + $0x88] sm:$0xff] }
  0x89   : > { %938 = vmatprep.mubr.f32.mxu0 %v1870_v7 }
  0x8c   : > { %1566 = vmatmul.mubr.msk.f32.gmra.mrb[6].mxu0 %vm336_vm0, %v818_v42  ;;  %v1794_v42 = vpack.c.bf16 %v1117_v41, %v1116_v40 }
 0x153   : > { %v922_v54 = vpop.f32.mrb[0].mxu0 }
 0x154   : > { %v2431_v55 = vadd.f32 %v958_v52, %v922_v54  ;;  %v924_v56 = vpop.f32.mrb[1].mxu0 }
 0x155   : > { %v966_v59 = vadd.f32 %v962_v53, %v924_v56 }
 0x156   : > { %v973_v63 = vmax.f32 %v2431_v55, 0.0 }
 0x157   : > { %v974_v60 = vmax.f32 %v966_v59, 0.0  ;;  %v928_v61 = vpop.f32.mrb[2].mxu0 }
 0x158   : > { %v2440_v0 = vadd.f32 %v958_v52, %v928_v61  ;;  %v930_v1 = vpop.f32.mrb[3].mxu0 }
 0x159   : > { %v2448_v4 = vadd.f32 %v962_v53, %v930_v1  ;;  %1567 = vmatprep.mubr.msk.f32.mxu1 %vm1002_vm1, %v974_v60 }
 0x15a   : > { %1080 = vmatmul.mubr.f32.vlgmr.msra.gmra.mrb[0].mxu1 %v973_v63  ;;  %v975_v9 = vmax.f32 %v2440_v0, 0.0 }
 0x15b   : > { %v976_v5 = vmax.f32 %v2448_v4, 0.0  ;;  %1771 = vmatpush1.bf16.msra.mxu1 %v1770_v62  ;;  %v934_v6 = vpop.f32.mrb[4].mxu0  ;;  %v1211_v4 = vld [vmem:[%s2564_s5 + $0x8] sm:$0x3f] }
 0x15c   : > { %v2455_v10 = vadd.f32 %v958_v52, %v934_v6  ;;  %v936_v11 = vpop.f32.mrb[5].mxu0  ;;  %1772 = vmatprep.subr.bf16.mxu1 %v1871_v21  ;;  %v1299_v6 = vld [vmem:[%s2565_s6 + $0x8] sm:$0x3f] }
 0x15d   : > { %v970_v14 = vadd.f32 %v962_v53, %v936_v11  ;;  %1568 = vmatprep.mubr.msk.f32.mxu1 %vm1002_vm1, %v976_v5 }
 0x15e   : > { %1085 = vmatmul.mubr.f32.gmra.mrb[2].mxu1 %v975_v9  ;;  %v977_v18 = vmax.f32 %v2455_v10, 0.0 }
 0x15f   : > { %v978_v15 = vmax.f32 %v970_v14, 0.0  ;;  %1774 = vmatpush1.bf16.msra.mxu1 %v1773_v8  ;;  %v940_v16 = vpop.f32.mrb[6].mxu0 }
 0x160   : > { %v971_v19 = vadd.f32 %v958_v52, %v940_v16  ;;  %v942_v20 = vpop.f32.mrb[7].mxu0  ;;  %1775 = vmatprep.subr.bf16.mxu1 %v1871_v21 }
 0x161   : > { %v972_v24 = vadd.f32 %v962_v53, %v942_v20  ;;  %1569 = vmatprep.mubr.msk.f32.mxu1 %vm1002_vm1, %v978_v15 }
 0x162   : > { %1090 = vmatmul.mubr.f32.gmra.mrb[4].mxu1 %v977_v18  ;;  %v979_v27 = vmax.f32 %v971_v19, 0.0 }
 0x163   : > { %v980_v25 = vmax.f32 %v972_v24, 0.0  ;;  %1777 = vmatpush1.bf16.msra.mxu1 %v1776_v17 }
 0x164   : > { %1778 = vmatprep.subr.bf16.mxu1 %v1871_v21 }
 0x165   : > { %1570 = vmatprep.mubr.msk.f32.mxu1 %vm1002_vm1, %v980_v25 }
 0x166   : > { %1095 = vmatmul.mubr.f32.gmra.mrb[6].mxu1 %v979_v27 }
 0x167   : > { %1780 = vmatpush1.bf16.msra.mxu1 %v1779_v26  ;;  %1571 = vmatprep.mubr.msk.f32.mxu1 %vm1002_vm1, %v974_v60 }
 0x168   : > { %1781 = vmatprep.subr.bf16.mxu1 %v1871_v21 }
 0x16b   : > { %1783 = vmatpush1.bf16.msra.mxu1 %v1782_v30 }
 0x16c   : > { %1784 = vmatprep.subr.bf16.mxu1 %v1871_v21 }
 0x16f   : > { %1786 = vmatpush1.bf16.msra.mxu1 %v1785_v33 }
 0x170   : > { %1787 = vmatprep.subr.bf16.mxu1 %v1871_v21 }
 0x173   : > { %1789 = vmatpush1.bf16.msra.mxu1 %v1788_v36 }
 0x174   : > { %1790 = vmatprep.subr.bf16.mxu1 %v1871_v21 }
 0x177   : > { %1792 = vmatpush1.bf16.msra.mxu1 %v1791_v39 }
 0x178   : > { %1793 = vmatprep.subr.bf16.mxu1 %v1871_v21 }
 0x17b   : > { %1795 = vmatpush1.bf16.msra.mxu1 %v1794_v42 }
 0x17c   : > { %1796 = vmatprep.subr.bf16.mxu1 %v1871_v21 }
 0x17f   : > { %1798 = vmatpush1.bf16.msra.mxu1 %v1797_v45 }
 0x180   : > { %1161 = vmatprep.subr.mxu1 %v1870_v7  ;;  %v1210_v7 = vld [vmem:[%s2564_s5] sm:$0xff] }
 0x183   : > { %1162 = vmatpush1.msra.mxu1 %v1120_v46 }
 0x184   : > { %1186 = vmatmul.mubr.f32.vlgmr.msra.gmra.mrb[8].mxu1 %v973_v63 }
 0x185   : > { %1572 = vmatprep.mubr.msk.f32.mxu1 %vm1002_vm1, %v976_v5  ;;  %v1298_v5 = vld [vmem:[%s2565_s6] sm:$0xff] }
 0x188   : > { %1191 = vmatmul.mubr.f32.gmra.mrb[10].mxu1 %v975_v9 }
 0x189   : > { %1573 = vmatprep.mubr.msk.f32.mxu1 %vm1002_vm1, %v978_v15 }
 0x18c   : > { %1196 = vmatmul.mubr.f32.gmra.mrb[12].mxu1 %v977_v18 }
 0x18d   : > { %1574 = vmatprep.mubr.msk.f32.mxu1 %vm1002_vm1, %v980_v25 }
 0x190   : > { %1201 = vmatmul.mubr.f32.gmra.mrb[14].mxu1 %v979_v27 }
 0x191   : > { %1605 = vmatprep.mubr.msk.f32.mxu1 %vm1212_vm2, %v1210_v7 }
 0x22d   : > { %v1081_v21 = vpop.f32.mrb[0].mxu1 }
 0x22e   : > { %v1083_v47 = vpop.f32.mrb[1].mxu1 }
 0x231   : > { %v1086_v48 = vpop.f32.mrb[2].mxu1 }
 0x232   : > { %v1088_v49 = vpop.f32.mrb[3].mxu1 }
 0x235   : > { %v1091_v50 = vpop.f32.mrb[4].mxu1 }
 0x236   : > { %v1093_v51 = vpop.f32.mrb[5].mxu1 }
 0x239   : > { %v1096_v52 = vpop.f32.mrb[6].mxu1 }
 0x23a   : > { %v1098_v53 = vpop.f32.mrb[7].mxu1 }
 0x257   : > { %v1187_v54 = vpop.f32.mrb[8].mxu1 }
 0x258   : > { %v1206_v55 = vmax.f32 %v1081_v21, %v1187_v54  ;;  %v1189_v56 = vpop.f32.mrb[9].mxu1 }
 0x25b   : > { %v1192_v57 = vpop.f32.mrb[10].mxu1 }
 0x25c   : > { %v1207_v58 = vmax.f32 %v1086_v48, %v1192_v57  ;;  %v1194_v59 = vpop.f32.mrb[11].mxu1 }
 0x25e   : > { %v1799_v60 = vpack.c.bf16 %v1207_v58, %v1206_v55 }
 0x25f   : > { %v1197_v61 = vpop.f32.mrb[12].mxu1 }
 0x260   : > { %v1208_v62 = vmax.f32 %v1091_v50, %v1197_v61  ;;  %v1199_v63 = vpop.f32.mrb[13].mxu1  ;;  %1800 = vmatprep.subr.bf16.mxu1 %v1799_v60 }
 0x261   : > { %1802 = vmatpush3.bf16.msra.mxu1 %v1799_v60 }
 0x263   : > { %v1202_v0 = vpop.f32.mrb[14].mxu1 }
 0x264   : > { %v1209_v1 = vmax.f32 %v1096_v52, %v1202_v0  ;;  %v1204_v2 = vpop.f32.mrb[15].mxu1 }
 0x266   : > { %v1803_v3 = vpack.c.bf16 %v1209_v1, %v1208_v62 }
 0x268   : > { %1805 = vmatprep.subr.msk.bf16.mxu1 %vm1804_vm5, %v1803_v3 }
 0x269   : > { %1808 = vmatpush3.bf16.msk.msra.mxu1 %vm1804_vm5, %v1803_v3 }
 0x26a   : > { %1810 = vmatprep.subr.bf16.mxu1 %v1799_v60 }
 0x26c   : > { %1606 = vmatmul.mubr.msk.f32.vlgmr.msra.gmra.mrb[16].mxu1 %vm1212_vm2, %v1211_v4 }
 0x26d   : > { %1812 = vmatpush3.bf16.msra.mxu1 %v1799_v60  ;;  %1616 = vmatprep.mubr.msk.f32.mxu1 %vm1212_vm2, %v1298_v5 }
 0x26e   : > { %1815 = vmatprep.subr.msk.bf16.mxu1 %vm1804_vm5, %v1803_v3 }
 0x271   : > { %1818 = vmatpush3.bf16.msk.msra.mxu1 %vm1804_vm5, %v1803_v3 }
 0x274   : > { %1617 = vmatmul.mubr.msk.f32.vlgmr.msra.gmra.mrb[18].mxu1 %vm1212_vm2, %v1299_v6 }
 0x33f   : > { %v1607_v8 = vpop.f32.mrb[16].mxu1 }
 0x340   : > { %v1289_v9 = vpop.f32.mrb[17].mxu1 }
 0x347   : > { %v1618_v10 = vpop.f32.mrb[18].mxu1 }
 0x348   : > { %v1382_v11 = vmax.f32 %v1607_v8, %v1618_v10  ;;  %v1372_v12 = vpop.f32.mrb[19].mxu1 }
 0x349   : > { %v1381_v13 = vmax.f32 %v1289_v9, %v1372_v12 }
 0x34a   : > { %1386 = vst.msk [vmem:[%s278_s19 + $0x8] sm:$0x3f] %vm1385_vm6, %v1382_v11 }
 0x34b   : > { %1384 = vst.msk [vmem:[%s278_s19] sm:$0xff] %vm1383_vm7, %v1381_v13 }
 0x34c PF: > { %s17_s24 = sadd.s32 1, %s1868_s24  }
 0x34d   : > { %p14_p4 = scmp.ge.s32.totalorder %s17_s24, 4  }
 0x34f   :  { %16 = sbr.rel (!%p14_p4) target bundleno = 1 (0x1), region = 82 }

// kernel: lenet_fa_forward.4
= control target key start
LH: loop header
LB: loop body
LE: loop exit
PB: predicated region body
PF: predicated region fallthrough
CT: control target
= control target key end

     0   :  { %s1683_s24 = smov 0   ;;  %s2242_s0 = inlined_call_operand.vmem [shape: f32[2,14,84], index: 0, kind: input, shape index: {}]   ;;  %s2243_s1 = inlined_call_operand.vmem [shape: f32[5,84,160], index: 1, kind: input, shape index: {}]   ;;  %s2244_s2 = inlined_call_operand.vmem [shape: f32[1,160], index: 2, kind: input, shape index: {}]   ;;  %s2245_s3 = inlined_call_operand.vmem [shape: f32[160,80], index: 3, kind: input, shape index: {}]   ;;  %s2246_s4 = inlined_call_operand.vmem [shape: f32[160,80], index: 4, kind: input, shape index: {}]   ;;  %s2247_s5 = inlined_call_operand.vmem [shape: f32[5,10], index: 5, kind: input, shape index: {}]   ;;  %s2248_s6 = inlined_call_operand.vmem [shape: f32[5,10], index: 6, kind: input, shape index: {}]   ;;  %s2249_s7 = inlined_call_operand.vmem [shape: f32[2,5,80], index: 7, kind: output, shape index: {}]  }
   0x1 LB: > { %s1288_s25 = sadd.s32 4294967295, %s1637_s24   ;;  %p1292_p0 = scmp.ge.s32.totalorder %s1637_s24, 1  ;;  %s1637_s24 = sphi %s1683_s24, %s17_s24  }
   0x2   : > { %p237_p1 = scmp.lt.s32.totalorder %s1637_s24, 3 }
   0x4   : > { %p238_p2 = pnand %p1292_p0, %p237_p1 }
   0x5   : > { %v1297_v0 = vld [vmem:[%s2243_s1 + $0xb8] sm:$0xff] (!%p238_p2)  ;;  %v1299_v1 = vld [vmem:[%s2243_s1 + $0xc8] sm:$0xff] (!%p238_p2)  ;;  %v1296_v2 = vld [vmem:[%s2243_s1 + $0xb0] sm:$0xff] (!%p238_p2)  ;;  %v1639_v7 = vmov (!%p238_p2), 0.0   ;;  %v1640_v13 = vmov (!%p238_p2), 0.0|0.0   ;;  %p268_p3 = scmp.lt.s32.totalorder (!%p238_p2), %s1288_s25, 1 }
   0x6   : > { %241 = sbr.rel (%p238_p2) target bundleno = 818 (0x332), region = 48  ;;  %v1435_v3 = vpack.c.bf16 (!%p238_p2), %v1299_v1, %v1297_v0  ;;  %v1298_v4 = vld [vmem:[%s2243_s1 + $0xc0] sm:$0xff] (!%p238_p2)  ;;  %v1301_v5 = vld [vmem:[%s2243_s1 + $0xd8] sm:$0xff] (!%p238_p2)  ;;  %v1303_v6 = vld [vmem:[%s2243_s1 + $0xe8] sm:$0xff] (!%p238_p2)  ;;  %404 = vmatprep.mubr.f32.mxu0 (!%p238_p2), %v1639_v7  ;;  %1535 = vmatprep.subr.bf16.mxu1 (!%p238_p2), %v1640_v13  ;;  %vm333_vm0 = vcmask (!%p238_p2), 1043456   ;;  %vm326_vm1 = vcmask (!%p238_p2), 687104  }
   0x7   : > { %v1437_v8 = vpack.c.bf16 (!%p238_p2), %v1298_v4, %v1296_v2  ;;  %v1439_v9 = vpack.c.bf16 (!%p238_p2), %v1303_v6, %v1301_v5  ;;  %v1300_v10 = vld [vmem:[%s2243_s1 + $0xd0] sm:$0xff] (!%p238_p2)  ;;  %v1302_v11 = vld [vmem:[%s2243_s1 + $0xe0] sm:$0xff] (!%p238_p2)  ;;  %v1305_v12 = vld [vmem:[%s2243_s1 + $0xf8] sm:$0xff] (!%p238_p2)  ;;  %vm900_vm2 = vcmask (!%p238_p2), 261120   ;;  %vm1641_vm3 = vmmov (!%p238_p2), 0  }
   0x8   : > { %1436 = vmatprep.subr.bf16.mxu0 (!%p238_p2), %v1435_v3  ;;  %v1307_v14 = vld [vmem:[%s2243_s1 + $0x108] sm:$0xff] (!%p238_p2)  ;;  %v1441_v15 = vpack.c.bf16 (!%p238_p2), %v1302_v11, %v1300_v10  ;;  %v1304_v17 = vld [vmem:[%s2243_s1 + $0xf0] sm:$0xff] (!%p238_p2)  ;;  %v1306_v18 = vld [vmem:[%s2243_s1 + $0x100] sm:$0xff] (!%p238_p2)  ;;  %vm1084_vm4 = vcmask (!%p238_p2), 1041408   ;;  %vm1642_vm5 = vmmov (!%p238_p2), 1   ;;  %vm1080_vm7 = vcmask (!%p238_p2), 80896  }
   0x9   : > { %1438 = vmatpush1.bf16.msra.mxu0 (!%p238_p2), %v1437_v8  ;;  %v1443_v16 = vpack.c.bf16 (!%p238_p2), %v1307_v14, %v1305_v12  ;;  %v1309_v19 = vld [vmem:[%s2243_s1 + $0x118] sm:$0xff] (!%p238_p2)  ;;  %v1311_v20 = vld [vmem:[%s2243_s1 + $0x128] sm:$0xff] (!%p238_p2)  ;;  %v1445_v21 = vpack.c.bf16 (!%p238_p2), %v1306_v18, %v1304_v17  ;;  %v1308_v23 = vld [vmem:[%s2243_s1 + $0x110] sm:$0xff] (!%p238_p2)  ;;  %vm1233_vm8 = vcmask (!%p238_p2), 651264  }
   0xa   : > { %1440 = vmatprep.subr.bf16.mxu0 (!%p238_p2), %v1439_v9  ;;  %v1447_v22 = vpack.c.bf16 (!%p238_p2), %v1311_v20, %v1309_v19  ;;  %v1310_v24 = vld [vmem:[%s2243_s1 + $0x120] sm:$0xff] (!%p238_p2)  ;;  %v1313_v25 = vld [vmem:[%s2243_s1 + $0x138] sm:$0xff] (!%p238_p2)  ;;  %v1315_v26 = vld [vmem:[%s2243_s1 + $0x148] sm:$0xff] (!%p238_p2) }
   0xb   : > { %v1449_v27 = vpack.c.bf16 (!%p238_p2), %v1310_v24, %v1308_v23  ;;  %v1451_v28 = vpack.c.bf16 (!%p238_p2), %v1315_v26, %v1313_v25  ;;  %v1312_v29 = vld [vmem:[%s2243_s1 + $0x130] sm:$0xff] (!%p238_p2)  ;;  %v1314_v30 = vld [vmem:[%s2243_s1 + $0x140] sm:$0xff] (!%p238_p2)  ;;  %v1317_v32 = vld [vmem:[%s2243_s1 + $0x158] sm:$0xf] (!%p238_p2) }
   0xc   : > { %v1453_v31 = vpack.c.bf16 (!%p238_p2), %v1314_v30, %v1312_v29  ;;  %v280_v33 = vld [vmem:[%s2243_s1 + $0x8] sm:$0xff] (!%p238_p2)  ;;  %v282_v34 = vld [vmem:[%s2243_s1 + $0x18] sm:$0xff] (!%p238_p2)  ;;  %v279_v35 = vld [vmem:[%s2243_s1] sm:$0xff] (!%p238_p2) }
   0xd   : > { %1442 = vmatpush1.bf16.msra.mxu0 %v1441_v15  ;;  %s2251_s25 = smov (!%p268_p3, %s1288_s25), 1  ;;  %v281_v36 = vld [vmem:[%s2243_s1 + $0x10] sm:$0xff]  ;;  %v284_v37 = vld [vmem:[%s2243_s1 + $0x28] sm:$0xff]  ;;  %v286_v38 = vld [vmem:[%s2243_s1 + $0x38] sm:$0xff]  ;;  %v1455_v40 = vpack.c.bf16 %v282_v34, %v280_v33 }
   0xe   : > { %1444 = vmatprep.subr.bf16.mxu0 %v1443_v16  ;;  %s1414_s22 = sshll.u32 %s2251_s25, 4  ;;  %v1316_v39 = vld [vmem:[%s2243_s1 + $0x150] sm:$0xf]  ;;  %v1457_v42 = vpack.c.bf16 %v281_v36, %v279_v35  ;;  %v1459_v43 = vpack.c.bf16 %v286_v38, %v284_v37  ;;  %v283_v44 = vld [vmem:[%s2243_s1 + $0x20] sm:$0xff]  ;;  %v288_v46 = vld [vmem:[%s2243_s1 + $0x48] sm:$0xff]  ;;  %s1295_s30 = sshll.u32 %s2251_s25, 3 }
   0xf   : > { %s1772_s10 = scalar_lea.vmem %s2242_s0, %s1414_s22  ;;  %v285_v45 = vld [vmem:[%s2243_s1 + $0x30] sm:$0xff]  ;;  %v290_v47 = vld [vmem:[%s2243_s1 + $0x58] sm:$0xff]  ;;  %v287_v51 = vld [vmem:[%s2243_s1 + $0x40] sm:$0xff]  ;;  %s276_s11 = scalar_lea.vmem %s2249_s7, %s1295_s30 }
  0x10   : > { %v301_v41 = vld [vmem:[%s1772_s10 + $0x1] sm:$0xff]  ;;  %v1461_v48 = vpack.c.bf16 %v285_v45, %v283_v44  ;;  %v302_v49 = vld [vmem:[%s1772_s10 + $0x9] sm:$0x3]  ;;  %v1463_v50 = vpack.c.bf16 %v290_v47, %v288_v46  ;;  %v289_v52 = vld [vmem:[%s2243_s1 + $0x50] sm:$0xff] }
  0x11   : > { %1446 = vmatpush1.bf16.msra.mxu0 %v1445_v21  ;;  %v292_v53 = vld [vmem:[%s2243_s1 + $0x68] sm:$0xff]  ;;  %v294_v54 = vld [vmem:[%s2243_s1 + $0x78] sm:$0xff]  ;;  %v1465_v55 = vpack.c.bf16 %v289_v52, %v287_v51  ;;  %v291_v57 = vld [vmem:[%s2243_s1 + $0x60] sm:$0xff] }
  0x12   : > { %1448 = vmatprep.subr.bf16.mxu0 %v1447_v22  ;;  %v1467_v56 = vpack.c.bf16 %v294_v54, %v292_v53  ;;  %v293_v58 = vld [vmem:[%s2243_s1 + $0x70] sm:$0xff]  ;;  %v296_v59 = vld [vmem:[%s2243_s1 + $0x88] sm:$0xff]  ;;  %v298_v60 = vld [vmem:[%s2243_s1 + $0x98] sm:$0xff] }
  0x13   : > { %v1469_v61 = vpack.c.bf16 %v293_v58, %v291_v57  ;;  %v1471_v62 = vpack.c.bf16 %v298_v60, %v296_v59  ;;  %v295_v63 = vld [vmem:[%s2243_s1 + $0x80] sm:$0xff]  ;;  %v297_v0 = vld [vmem:[%s2243_s1 + $0x90] sm:$0xff]  ;;  %v300_v2 = vld [vmem:[%s2243_s1 + $0xa8] sm:$0xf] }
  0x14   : > { %v1473_v1 = vpack.c.bf16 %v297_v0, %v295_v63  ;;  %v1327_v3 = vld [vmem:[%s2243_s1 + $0x168] sm:$0xff]  ;;  %v1329_v4 = vld [vmem:[%s2243_s1 + $0x178] sm:$0xff]  ;;  %v880_v5 = vld [vmem:[%s2245_s3] sm:$0xff] }
  0x15   : > { %1450 = vmatpush1.bf16.msra.mxu0 %v1449_v27  ;;  %v881_v6 = vld [vmem:[%s2245_s3 + $0x8] sm:$0xff]  ;;  %v1326_v8 = vld [vmem:[%s2243_s1 + $0x160] sm:$0xff]  ;;  %v1328_v9 = vld [vmem:[%s2243_s1 + $0x170] sm:$0xff]  ;;  %v1475_v17 = vpack.c.bf16 %v1329_v4, %v1327_v3 }
  0x16   : > { %1452 = vmatprep.subr.bf16.mxu0 %v1451_v28  ;;  %v1331_v10 = vld [vmem:[%s2243_s1 + $0x188] sm:$0xff]  ;;  %v1536_v11 = vpack.c.bf16 %v881_v6, %v880_v5  ;;  %v1333_v12 = vld [vmem:[%s2243_s1 + $0x198] sm:$0xff]  ;;  %v882_v14 = vld [vmem:[%s2245_s3 + $0x10] sm:$0xff]  ;;  %v1477_v19 = vpack.c.bf16 %v1328_v9, %v1326_v8 }
  0x17   : > { %v883_v15 = vld [vmem:[%s2245_s3 + $0x18] sm:$0xff]  ;;  %v299_v16 = vld [vmem:[%s2243_s1 + $0xa0] sm:$0xf]  ;;  %v1479_v20 = vpack.c.bf16 %v1333_v12, %v1331_v10  ;;  %v1332_v22 = vld [vmem:[%s2243_s1 + $0x190] sm:$0xff] }
  0x18   : > { %1537 = vmatpush1.bf16.msra.mxu1 %v1536_v11  ;;  %v277_v18 = vld [vmem:[%s1772_s10] sm:$0xff]  ;;  %v1335_v23 = vld [vmem:[%s2243_s1 + $0x1a8] sm:$0xff]  ;;  %v1539_v24 = vpack.c.bf16 %v883_v15, %v882_v14  ;;  %v1337_v25 = vld [vmem:[%s2243_s1 + $0x1b8] sm:$0xff] }
  0x19   : > { %1454 = vmatpush1.bf16.msra.mxu0 %v1453_v31  ;;  %1538 = vmatprep.subr.bf16.mxu1 %v1640_v13  ;;  %v1330_v21 = vld [vmem:[%s2243_s1 + $0x180] sm:$0xff]  ;;  %v885_v27 = vld [vmem:[%s2245_s3 + $0x28] sm:$0xff]  ;;  %v1483_v30 = vpack.c.bf16 %v1337_v25, %v1335_v23  ;;  %v1341_v35 = vld [vmem:[%s2243_s1 + $0x1d8] sm:$0xff] }
  0x1a   : > { %1318 = vmatprep.subr.msk.mxu0 %vm333_vm0, %v1317_v32  ;;  %v884_v26 = vld [vmem:[%s2245_s3 + $0x20] sm:$0xff]  ;;  %v1481_v28 = vpack.c.bf16 %v1332_v22, %v1330_v21  ;;  %v278_v29 = vld [vmem:[%s1772_s10 + $0x8] sm:$0x3]  ;;  %v1336_v32 = vld [vmem:[%s2243_s1 + $0x1b0] sm:$0xff] }
  0x1b   : > { %v1334_v31 = vld [vmem:[%s2243_s1 + $0x1a0] sm:$0xff]  ;;  %v1339_v33 = vld [vmem:[%s2243_s1 + $0x1c8] sm:$0xff]  ;;  %v1542_v34 = vpack.c.bf16 %v885_v27, %v884_v26  ;;  %v886_v36 = vld [vmem:[%s2245_s3 + $0x30] sm:$0xff] }
  0x1c   : > { %1540 = vmatpush1.bf16.msra.mxu1 %v1539_v24  ;;  %v887_v37 = vld [vmem:[%s2245_s3 + $0x38] sm:$0xff]  ;;  %v1485_v38 = vpack.c.bf16 %v1336_v32, %v1334_v31  ;;  %v888_v45 = vld [vmem:[%s2245_s3 + $0x40] sm:$0xff]  ;;  %v889_v46 = vld [vmem:[%s2245_s3 + $0x48] sm:$0xff] }
  0x1d   : > { %1319 = vmatpush1.msk.msra.mxu0 %vm333_vm0, %v1316_v39  ;;  %1541 = vmatprep.subr.bf16.mxu1 %v1640_v13  ;;  %v1487_v39 = vpack.c.bf16 %v1341_v35, %v1339_v33  ;;  %v1345_v44 = vld [vmem:[%s2243_s1 + $0x1f8] sm:$0xff]  ;;  %v1548_v51 = vpack.c.bf16 %v889_v46, %v888_v45  ;;  %v890_v52 = vld [vmem:[%s2245_s3 + $0x50] sm:$0xff]  ;;  %v1355_v58 = vld [vmem:[%s2243_s1 + $0x228] sm:$0xff] }
  0x1e   : > { %1456 = vmatprep.subr.bf16.mxu0 %v1455_v40  ;;  %1320 = vmatmul.mubr.msk.f32.vlgmr.msra.gmra.mrb[0].mxu0 %vm326_vm1, %v301_v41  ;;  %v1338_v40 = vld [vmem:[%s2243_s1 + $0x1c0] sm:$0xff]  ;;  %v1340_v41 = vld [vmem:[%s2243_s1 + $0x1d0] sm:$0xff]  ;;  %v891_v53 = vld [vmem:[%s2245_s3 + $0x58] sm:$0xff] }
  0x1f   : > { %1458 = vmatpush1.bf16.msra.mxu0 %v1457_v42  ;;  %410 = vmatprep.mubr.f32.mxu0 %v1639_v7  ;;  %v1343_v42 = vld [vmem:[%s2243_s1 + $0x1e8] sm:$0xff]  ;;  %v1489_v47 = vpack.c.bf16 %v1340_v41, %v1338_v40  ;;  %v1353_v57 = vld [vmem:[%s2243_s1 + $0x218] sm:$0xff]  ;;  %v1352_v59 = vld [vmem:[%s2243_s1 + $0x210] sm:$0xff] }
  0x20   : > { %1460 = vmatprep.subr.bf16.mxu0 %v1459_v43  ;;  %1543 = vmatpush1.bf16.msra.mxu1 %v1542_v34  ;;  %v1545_v43 = vpack.c.bf16 %v887_v37, %v886_v36  ;;  %v1354_v60 = vld [vmem:[%s2243_s1 + $0x220] sm:$0xff]  ;;  %v893_v0 = vld [vmem:[%s2245_s3 + $0x68] sm:$0xff]  ;;  %v1356_v6 = vld [vmem:[%s2243_s1 + $0x230] sm:$0xff] }
  0x21   : > { %1544 = vmatprep.subr.bf16.mxu1 %v1640_v13  ;;  %v892_v63 = vld [vmem:[%s2245_s3 + $0x60] sm:$0xff]  ;;  %v1497_v4 = vpack.c.bf16 %v1354_v60, %v1352_v59  ;;  %v1361_v9 = vld [vmem:[%s2243_s1 + $0x258] sm:$0xff]  ;;  %v1363_v11 = vld [vmem:[%s2243_s1 + $0x268] sm:$0xff] }
  0x22   : > { %1321 = vmatmul.mubr.msk.f32.gmra.mrb[2].mxu0 %vm326_vm1, %v302_v49  ;;  %v1342_v49 = vld [vmem:[%s2243_s1 + $0x1e0] sm:$0xff]  ;;  %v1554_v10 = vpack.c.bf16 %v893_v0, %v892_v63  ;;  %v894_v12 = vld [vmem:[%s2245_s3 + $0x70] sm:$0xff]  ;;  %v895_v14 = vld [vmem:[%s2245_s3 + $0x78] sm:$0xff] }
  0x23   : > { %1462 = vmatpush1.bf16.msra.mxu0 %v1461_v48  ;;  %493 = vmatprep.mubr.f32.mxu0 %v1639_v7  ;;  %v1491_v48 = vpack.c.bf16 %v1345_v44, %v1343_v42  ;;  %v506_v3 = vld [vmem:[%s1772_s10 + $0x2] sm:$0xff]  ;;  %v1557_v21 = vpack.c.bf16 %v895_v14, %v894_v12  ;;  %v1364_v27 = vld [vmem:[%s2243_s1 + $0x270] sm:$0xff]  ;;  %v1373_v37 = vld [vmem:[%s2243_s1 + $0x2b8] sm:$0xf] }
  0x24   : > { %1464 = vmatprep.subr.bf16.mxu0 %v1463_v50  ;;  %v1344_v50 = vld [vmem:[%s2243_s1 + $0x1f0] sm:$0xff]  ;;  %1546 = vmatpush1.bf16.msra.mxu1 %v1545_v43  ;;  %v1358_v8 = vld [vmem:[%s2243_s1 + $0x240] sm:$0xff]  ;;  %v1367_v22 = vld [vmem:[%s2243_s1 + $0x288] sm:$0xff] }
  0x25   : > { %1547 = vmatprep.subr.bf16.mxu1 %v1640_v13  ;;  %v1493_v54 = vpack.c.bf16 %v1344_v50, %v1342_v49  ;;  %v1501_v15 = vpack.c.bf16 %v1358_v8, %v1356_v6  ;;  %v896_v23 = vld [vmem:[%s2245_s3 + $0x80] sm:$0xff]  ;;  %v897_v24 = vld [vmem:[%s2245_s3 + $0x88] sm:$0xff]  ;;  %v1368_v34 = vld [vmem:[%s2243_s1 + $0x290] sm:$0xff] }
  0x26   : > { %v1371_v31 = vld [vmem:[%s2243_s1 + $0x2a8] sm:$0xff]  ;;  %v1370_v35 = vld [vmem:[%s2243_s1 + $0x2a0] sm:$0xff]  ;;  %v1380_v41 = vld [vmem:[%s2243_s1 + $0x2d0] sm:$0xff] }
  0x27   : > { %1466 = vmatpush1.bf16.msra.mxu0 %v1465_v55  ;;  %v1551_v55 = vpack.c.bf16 %v891_v53, %v890_v52  ;;  %v1513_v36 = vpack.c.bf16 %v1370_v35, %v1368_v34  ;;  %v1378_v40 = vld [vmem:[%s2243_s1 + $0x2c0] sm:$0xff]  ;;  %v1383_v42 = vld [vmem:[%s2243_s1 + $0x2e8] sm:$0xff]  ;;  %v1385_v43 = vld [vmem:[%s2243_s1 + $0x2f8] sm:$0xff] }
  0x28   : > { %1468 = vmatprep.subr.bf16.mxu0 %v1467_v56  ;;  %1549 = vmatpush1.bf16.msra.mxu1 %v1548_v51  ;;  %v1347_v56 = vld [vmem:[%s2243_s1 + $0x208] sm:$0xf]  ;;  %v1372_v44 = vld [vmem:[%s2243_s1 + $0x2b0] sm:$0xf]  ;;  %v1382_v49 = vld [vmem:[%s2243_s1 + $0x2e0] sm:$0xff] }
  0x29   : > { %1550 = vmatprep.subr.bf16.mxu1 %v1640_v13  ;;  %v624_v46 = vld [vmem:[%s1772_s10 + $0x3] sm:$0xff]  ;;  %v1384_v50 = vld [vmem:[%s2243_s1 + $0x2f0] sm:$0xff]  ;;  %v1389_v52 = vld [vmem:[%s2243_s1 + $0x318] sm:$0xff] }
  0x2a   : > { %v1387_v51 = vld [vmem:[%s2243_s1 + $0x308] sm:$0xff]  ;;  %v1521_v53 = vpack.c.bf16 %v1384_v50, %v1382_v49  ;;  %v1393_v59 = vld [vmem:[%s2243_s1 + $0x338] sm:$0xff]  ;;  %v1392_v63 = vld [vmem:[%s2243_s1 + $0x330] sm:$0xff] }
  0x2b   : > { %1470 = vmatpush1.bf16.msra.mxu0 %v1469_v61  ;;  %v1357_v61 = vld [vmem:[%s2243_s1 + $0x238] sm:$0xff]  ;;  %v1395_v0 = vld [vmem:[%s2243_s1 + $0x348] sm:$0xff]  ;;  %v898_v12 = vld [vmem:[%s2245_s3 + $0x90] sm:$0xff] }
  0x2c   : > { %1472 = vmatprep.subr.bf16.mxu0 %v1471_v62  ;;  %v1359_v62 = vld [vmem:[%s2243_s1 + $0x248] sm:$0xff]  ;;  %1552 = vmatpush1.bf16.msra.mxu1 %v1551_v55  ;;  %v1523_v55 = vpack.c.bf16 %v1389_v52, %v1387_v51  ;;  %v899_v14 = vld [vmem:[%s2245_s3 + $0x98] sm:$0xff]  ;;  %v984_v35 = vld [vmem:[%s2246_s4 + $0x10] sm:$0xff] }
  0x2d   : > { %1553 = vmatprep.subr.bf16.mxu1 %v1640_v13  ;;  %v1499_v5 = vpack.c.bf16 %v1359_v62, %v1357_v61  ;;  %v1390_v62 = vld [vmem:[%s2243_s1 + $0x320] sm:$0xff]  ;;  %v1399_v8 = vld [vmem:[%s2243_s1 + $0x368] sm:$0xf]  ;;  %v992_v50 = vld [vmem:[%s2246_s4 + $0x50] sm:$0xff] }
  0x2e   : > { %v993_v51 = vld [vmem:[%s2246_s4 + $0x58] sm:$0xff]  ;;  %vm1597_vm6 = vmpackc.low %vm1084_vm4, %vm1642_vm5 }
  0x2f   : > { %1474 = vmatpush1.bf16.msra.mxu0 %v1473_v1  ;;  %v1346_v1 = vld [vmem:[%s2243_s1 + $0x200] sm:$0xf]  ;;  %v1581_v52 = vpack.c.bf16 %v993_v51, %v992_v50 }
  0x30   : > { %1322 = vmatprep.subr.msk.mxu0 %vm333_vm0, %v300_v2  ;;  %v1495_v2 = vpack.c.bf16 %v1355_v58, %v1353_v57  ;;  %1555 = vmatpush1.bf16.msra.mxu1 %v1554_v10  ;;  %v1388_v57 = vld [vmem:[%s2243_s1 + $0x310] sm:$0xff]  ;;  %v1391_v58 = vld [vmem:[%s2243_s1 + $0x328] sm:$0xff] }
  0x31   : > { %1556 = vmatprep.subr.bf16.mxu1 %v1640_v13  ;;  %v1527_v61 = vpack.c.bf16 %v1393_v59, %v1391_v58  ;;  %v742_v10 = vld [vmem:[%s1772_s10 + $0x4] sm:$0xff] }
  0x32   : > { %v998_v59 = vld [vmem:[%s2246_s4 + $0x80] sm:$0xff] }
  0x33   : > { %1323 = vmatpush1.msk.msra.mxu0 %vm333_vm0, %v299_v16  ;;  %v507_v16 = vld [vmem:[%s1772_s10 + $0xa] sm:$0x3] }
  0x34   : > { %1476 = vmatprep.subr.bf16.mxu0 %v1475_v17  ;;  %1324 = vmatmul.mubr.msk.f32.vlgmr.msra.gmra.mrb[0].mxu0 %vm326_vm1, %v277_v18  ;;  %v1503_v17 = vpack.c.bf16 %v1363_v11, %v1361_v9  ;;  %v1360_v18 = vld [vmem:[%s2243_s1 + $0x250] sm:$0xff]  ;;  %v1398_v9 = vld [vmem:[%s2243_s1 + $0x360] sm:$0xf]  ;;  %v743_v11 = vld [vmem:[%s1772_s10 + $0xc] sm:$0x3] }
  0x35   : > { %1478 = vmatpush1.bf16.msra.mxu0 %v1477_v19  ;;  %499 = vmatprep.mubr.f32.mxu0 %v1639_v7  ;;  %v1362_v19 = vld [vmem:[%s2243_s1 + $0x260] sm:$0xff] }
  0x36   : > { %1480 = vmatprep.subr.bf16.mxu0 %v1479_v20  ;;  %v1365_v20 = vld [vmem:[%s2243_s1 + $0x278] sm:$0xff]  ;;  %v1505_v25 = vpack.c.bf16 %v1362_v19, %v1360_v18  ;;  %1558 = vmatpush1.bf16.msra.mxu1 %v1557_v21  ;;  %v860_v19 = vld [vmem:[%s2244_s2] sm:$0x3] }
  0x37   : > { %v1507_v26 = vpack.c.bf16 %v1367_v22, %v1365_v20  ;;  %1559 = vmatprep.subr.bf16.mxu1 %v1640_v13 }
  0x38   : > { %1325 = vmatmul.mubr.msk.f32.gmra.mrb[2].mxu0 %vm326_vm1, %v278_v29  ;;  %v1560_v29 = vpack.c.bf16 %v897_v24, %v896_v23 }
  0x39   : > { %1482 = vmatpush1.bf16.msra.mxu0 %v1481_v28  ;;  %607 = vmatprep.mubr.f32.mxu0 %v1639_v7  ;;  %v1366_v28 = vld [vmem:[%s2243_s1 + $0x280] sm:$0xff] }
  0x3a   : > { %1484 = vmatprep.subr.bf16.mxu0 %v1483_v30  ;;  %v1369_v30 = vld [vmem:[%s2243_s1 + $0x298] sm:$0xff]  ;;  %v1509_v32 = vpack.c.bf16 %v1366_v28, %v1364_v27  ;;  %1561 = vmatpush1.bf16.msra.mxu1 %v1560_v29  ;;  %v983_v27 = vld [vmem:[%s2246_s4 + $0x8] sm:$0xff] }
  0x3b   : > { %v1511_v33 = vpack.c.bf16 %v1371_v31, %v1369_v30  ;;  %1562 = vmatprep.subr.bf16.mxu1 %v1640_v13 }
  0x3d   : > { %1486 = vmatpush1.bf16.msra.mxu0 %v1485_v38  ;;  %v1379_v38 = vld [vmem:[%s2243_s1 + $0x2c8] sm:$0xff] }
  0x3e   : > { %1488 = vmatprep.subr.bf16.mxu0 %v1487_v39  ;;  %v1381_v39 = vld [vmem:[%s2243_s1 + $0x2d8] sm:$0xff] }
  0x3f   : > { %v1515_v45 = vpack.c.bf16 %v1381_v39, %v1379_v38 }
  0x41   : > { %1490 = vmatpush1.bf16.msra.mxu0 %v1489_v47  ;;  %v1517_v47 = vpack.c.bf16 %v1380_v41, %v1378_v40  ;;  %v986_v41 = vld [vmem:[%s2246_s4 + $0x20] sm:$0xff] }
  0x42   : > { %1492 = vmatprep.subr.bf16.mxu0 %v1491_v48  ;;  %v1519_v48 = vpack.c.bf16 %v1385_v43, %v1383_v42  ;;  %v987_v42 = vld [vmem:[%s2246_s4 + $0x28] sm:$0xff] }
  0x43   : > { %v1572_v43 = vpack.c.bf16 %v987_v42, %v986_v41 }
  0x45   : > { %1494 = vmatpush1.bf16.msra.mxu0 %v1493_v54  ;;  %v625_v54 = vld [vmem:[%s1772_s10 + $0xb] sm:$0x3] }
  0x46   : > { %1348 = vmatprep.subr.msk.mxu0 %vm333_vm0, %v1347_v56  ;;  %v1386_v56 = vld [vmem:[%s2243_s1 + $0x300] sm:$0xff] }
  0x47   : > { %v1525_v60 = vpack.c.bf16 %v1388_v57, %v1386_v56  ;;  %v996_v56 = vld [vmem:[%s2246_s4 + $0x70] sm:$0xff]  ;;  %v997_v57 = vld [vmem:[%s2246_s4 + $0x78] sm:$0xff] }
  0x48   : > { %v1587_v58 = vpack.c.bf16 %v997_v57, %v996_v56 }
  0x49   : > { %1349 = vmatpush1.msk.msra.mxu0 %vm333_vm0, %v1346_v1  ;;  %v1397_v1 = vld [vmem:[%s2243_s1 + $0x358] sm:$0xff] }
  0x4a   : > { %1496 = vmatprep.subr.bf16.mxu0 %v1495_v2  ;;  %1350 = vmatmul.mubr.msk.f32.vlgmr.msra.gmra.mrb[0].mxu0 %vm326_vm1, %v506_v3  ;;  %v1529_v2 = vpack.c.bf16 %v1392_v63, %v1390_v62  ;;  %v1531_v3 = vpack.c.bf16 %v1397_v1, %v1395_v0  ;;  %v1000_v62 = vld [vmem:[%s2246_s4 + $0x90] sm:$0xff]  ;;  %v1001_v63 = vld [vmem:[%s2246_s4 + $0x98] sm:$0xff] }
  0x4b   : > { %1498 = vmatpush1.bf16.msra.mxu0 %v1497_v4  ;;  %613 = vmatprep.mubr.f32.mxu0 %v1639_v7  ;;  %v1394_v4 = vld [vmem:[%s2243_s1 + $0x340] sm:$0xff]  ;;  %v1593_v0 = vpack.c.bf16 %v1001_v63, %v1000_v62 }
  0x4c   : > { %1500 = vmatprep.subr.bf16.mxu0 %v1499_v5  ;;  %v1396_v5 = vld [vmem:[%s2243_s1 + $0x350] sm:$0xff] }
  0x4d   : > { %v1533_v6 = vpack.c.bf16 %v1396_v5, %v1394_v4 }
  0x4e   : > { %1351 = vmatmul.mubr.msk.f32.gmra.mrb[2].mxu0 %vm326_vm1, %v507_v16  ;;  %v862_v16 = vlaneseq }
  0x4f   : > { %1502 = vmatpush1.bf16.msra.mxu0 %v1501_v15  ;;  %725 = vmatprep.mubr.f32.mxu0 %v1639_v7  ;;  %v1563_v15 = vpack.c.bf16 %v899_v14, %v898_v12  ;;  %v1079_v14 = vld [vmem:[%s2247_s5] sm:$0x1f] }
  0x50   : > { %1504 = vmatprep.subr.bf16.mxu0 %v1503_v17  ;;  %v863_v17 = vshrl.u32 %v862_v16, 7 }
  0x51   : > { %1564 = vmatpush1.bf16.msra.mxu1 %v1563_v15  ;;  %v1158_v15 = vld [vmem:[%s2248_s6] sm:$0x1f] }
  0x52   : > { %1565 = vmatprep.subr.bf16.mxu1 %v1640_v13  ;;  %v864_v18 = vsub.s32 0, %v863_v17  ;;  %v868_v20 = vsub.s32 1, %v863_v17 }
  0x53   : > { %1506 = vmatpush1.bf16.msra.mxu0 %v1505_v25 }
  0x54   : > { %1508 = vmatprep.subr.bf16.mxu0 %v1507_v26  ;;  %v865_v21 = vrot.slane %v860_v19, %v864_v18  ;;  %v869_v22 = vrot.slane %v860_v19, %v868_v20  ;;  %v982_v26 = vld [vmem:[%s2246_s4] sm:$0xff] }
  0x55   : > { %v1566_v31 = vpack.c.bf16 %v983_v27, %v982_v26 }
  0x57   : > { %1510 = vmatpush1.bf16.msra.mxu0 %v1509_v32 }
  0x58   : > { %1512 = vmatprep.subr.bf16.mxu0 %v1511_v33 }
  0x5b   : > { %1514 = vmatpush1.bf16.msra.mxu0 %v1513_v36  ;;  %v985_v36 = vld [vmem:[%s2246_s4 + $0x18] sm:$0xff] }
  0x5c   : > { %1374 = vmatprep.subr.msk.mxu0 %vm333_vm0, %v1373_v37  ;;  %v1569_v39 = vpack.c.bf16 %v985_v36, %v984_v35 }
  0x5f   : > { %1375 = vmatpush1.msk.msra.mxu0 %vm333_vm0, %v1372_v44  ;;  %v988_v44 = vld [vmem:[%s2246_s4 + $0x30] sm:$0xff] }
  0x60   : > { %1516 = vmatprep.subr.bf16.mxu0 %v1515_v45  ;;  %1376 = vmatmul.mubr.msk.f32.vlgmr.msra.gmra.mrb[0].mxu0 %vm326_vm1, %v624_v46  ;;  %v989_v45 = vld [vmem:[%s2246_s4 + $0x38] sm:$0xff] }
  0x61   : > { %1518 = vmatpush1.bf16.msra.mxu0 %v1517_v47  ;;  %731 = vmatprep.mubr.f32.mxu0 %v1639_v7  ;;  %v1575_v46 = vpack.c.bf16 %v989_v45, %v988_v44  ;;  %v990_v47 = vld [vmem:[%s2246_s4 + $0x40] sm:$0xff] }
  0x62   : > { %1520 = vmatprep.subr.bf16.mxu0 %v1519_v48  ;;  %v991_v48 = vld [vmem:[%s2246_s4 + $0x48] sm:$0xff] }
  0x63   : > { %v1578_v49 = vpack.c.bf16 %v991_v48, %v990_v47 }
  0x64   : > { %1377 = vmatmul.mubr.msk.f32.gmra.mrb[2].mxu0 %vm326_vm1, %v625_v54  ;;  %v995_v54 = vld [vmem:[%s2246_s4 + $0x68] sm:$0xff] }
  0x65   : > { %1522 = vmatpush1.bf16.msra.mxu0 %v1521_v53  ;;  %843 = vmatprep.mubr.f32.mxu0 %v1639_v7  ;;  %v994_v53 = vld [vmem:[%s2246_s4 + $0x60] sm:$0xff] }
  0x66   : > { %1524 = vmatprep.subr.bf16.mxu0 %v1523_v55  ;;  %v1584_v55 = vpack.c.bf16 %v995_v54, %v994_v53 }
  0x69   : > { %1526 = vmatpush1.bf16.msra.mxu0 %v1525_v60  ;;  %v999_v60 = vld [vmem:[%s2246_s4 + $0x88] sm:$0xff] }
  0x6a   : > { %1528 = vmatprep.subr.bf16.mxu0 %v1527_v61  ;;  %v1590_v61 = vpack.c.bf16 %v999_v60, %v998_v59 }
  0x6d   : > { %1530 = vmatpush1.bf16.msra.mxu0 %v1529_v2 }
  0x6e   : > { %1532 = vmatprep.subr.bf16.mxu0 %v1531_v3 }
  0x71   : > { %1534 = vmatpush1.bf16.msra.mxu0 %v1533_v6 }
  0x72   : > { %1400 = vmatprep.subr.msk.mxu0 %vm333_vm0, %v1399_v8 }
  0x75   : > { %1401 = vmatpush1.msk.msra.mxu0 %vm333_vm0, %v1398_v9 }
  0x76   : > { %1402 = vmatmul.mubr.msk.f32.vlgmr.msra.gmra.mrb[0].mxu0 %vm326_vm1, %v742_v10 }
  0x77   : > { %849 = vmatprep.mubr.f32.mxu0 %v1639_v7 }
  0x7a   : > { %1403 = vmatmul.mubr.msk.f32.gmra.mrb[2].mxu0 %vm326_vm1, %v743_v11 }
 0x149   : > { %v845_v23 = vpop.f32.mrb[0].mxu0 }
 0x14a   : > { %v2147_v24 = vadd.f32 %v865_v21, %v845_v23  ;;  %v847_v25 = vpop.f32.mrb[1].mxu0 }
 0x14b   : > { %v873_v28 = vadd.f32 %v869_v22, %v847_v25 }
 0x14c   : > { %v876_v32 = vmax.f32 %v2147_v24, 0.0 }
 0x14d   : > { %v877_v29 = vmax.f32 %v873_v28, 0.0  ;;  %v851_v30 = vpop.f32.mrb[2].mxu0 }
 0x14e   : > { %v874_v33 = vadd.f32 %v865_v21, %v851_v30  ;;  %v853_v34 = vpop.f32.mrb[3].mxu0 }
 0x14f   : > { %v875_v37 = vadd.f32 %v869_v22, %v853_v34  ;;  %1404 = vmatprep.mubr.msk.f32.mxu1 %vm900_vm2, %v877_v29 }
 0x150   : > { %972 = vmatmul.mubr.f32.vlgmr.msra.gmra.mrb[0].mxu1 %v876_v32  ;;  %v878_v40 = vmax.f32 %v874_v33, 0.0 }
 0x151   : > { %v879_v38 = vmax.f32 %v875_v37, 0.0  ;;  %1567 = vmatpush1.bf16.msra.mxu1 %v1566_v31 }
 0x152   : > { %1568 = vmatprep.subr.bf16.mxu1 %v1640_v13 }
 0x153   : > { %1405 = vmatprep.mubr.msk.f32.mxu1 %vm900_vm2, %v879_v38 }
 0x154   : > { %977 = vmatmul.mubr.f32.gmra.mrb[2].mxu1 %v878_v40 }
 0x155   : > { %1570 = vmatpush1.bf16.msra.mxu1 %v1569_v39  ;;  %1406 = vmatprep.mubr.msk.f32.mxu1 %vm900_vm2, %v877_v29 }
 0x156   : > { %1571 = vmatprep.subr.bf16.mxu1 %v1640_v13 }
 0x159   : > { %1573 = vmatpush1.bf16.msra.mxu1 %v1572_v43 }
 0x15a   : > { %1574 = vmatprep.subr.bf16.mxu1 %v1640_v13 }
 0x15d   : > { %1576 = vmatpush1.bf16.msra.mxu1 %v1575_v46 }
 0x15e   : > { %1577 = vmatprep.subr.bf16.mxu1 %v1640_v13 }
 0x161   : > { %1579 = vmatpush1.bf16.msra.mxu1 %v1578_v49 }
 0x162   : > { %1580 = vmatprep.subr.bf16.mxu1 %v1640_v13 }
 0x165   : > { %1582 = vmatpush1.bf16.msra.mxu1 %v1581_v52 }
 0x166   : > { %1583 = vmatprep.subr.bf16.mxu1 %v1640_v13 }
 0x169   : > { %1585 = vmatpush1.bf16.msra.mxu1 %v1584_v55 }
 0x16a   : > { %1586 = vmatprep.subr.bf16.mxu1 %v1640_v13 }
 0x16d   : > { %1588 = vmatpush1.bf16.msra.mxu1 %v1587_v58 }
 0x16e   : > { %1589 = vmatprep.subr.bf16.mxu1 %v1640_v13 }
 0x171   : > { %1591 = vmatpush1.bf16.msra.mxu1 %v1590_v61 }
 0x172   : > { %1592 = vmatprep.subr.bf16.mxu1 %v1640_v13 }
 0x175   : > { %1594 = vmatpush1.bf16.msra.mxu1 %v1593_v0 }
 0x176   : > { %1595 = vmatprep.subr.bf16.mxu1 %v1640_v13 }
 0x178   : > { %1067 = vmatmul.mubr.f32.vlgmr.msra.gmra.mrb[4].mxu1 %v876_v32 }
 0x179   : > { %1407 = vmatprep.mubr.msk.f32.mxu1 %vm900_vm2, %v879_v38 }
 0x17c   : > { %1072 = vmatmul.mubr.f32.gmra.mrb[6].mxu1 %v878_v40 }
 0x17d   : > { %1425 = vmatprep.mubr.msk.f32.mxu1 %vm1641_vm3, %v1639_v7 }
 0x223   : > { %v973_v1 = vpop.f32.mrb[0].mxu1 }
 0x224   : > { %v975_v2 = vpop.f32.mrb[1].mxu1 }
 0x227   : > { %v978_v3 = vpop.f32.mrb[2].mxu1 }
 0x228   : > { %v980_v4 = vpop.f32.mrb[3].mxu1 }
 0x24b   : > { %v1068_v5 = vpop.f32.mrb[4].mxu1 }
 0x24c   : > { %v1077_v6 = vmax.f32 %v973_v1, %v1068_v5  ;;  %v1070_v8 = vpop.f32.mrb[5].mxu1 }
 0x24f   : > { %v1073_v9 = vpop.f32.mrb[6].mxu1 }
 0x250   : > { %v1078_v10 = vmax.f32 %v978_v3, %v1073_v9  ;;  %v1075_v11 = vpop.f32.mrb[7].mxu1 }
 0x252   : > { %v1596_v12 = vpack.c.bf16 %v1078_v10, %v1077_v6 }
 0x254   : > { %1598 = vmatpush3.bf16.msk.msra.mxu1 %vm1597_vm6, %v1596_v12 }
 0x255   : > { %1599 = vmatprep.subr.bf16.mxu1 %v1640_v13 }
 0x257   : > { %1426 = vmatmul.mubr.msk.f32.vlgmr.msra.gmra.mrb[8].mxu1 %vm1080_vm7, %v1079_v14 }
 0x258   : > { %1602 = vmatpush3.bf16.msk.msra.mxu1 %vm1597_vm6, %v1596_v12  ;;  %1432 = vmatprep.mubr.msk.f32.mxu1 %vm1641_vm3, %v1639_v7 }
 0x25b   : > { %1433 = vmatmul.mubr.msk.f32.vlgmr.msra.gmra.mrb[10].mxu1 %vm1080_vm7, %v1158_v15 }
 0x32a   : > { %v1154_v16 = vpop.f32.mrb[8].mxu1 }
 0x32b   : > { %v1427_v17 = vpop.f32.mrb[9].mxu1 }
 0x32e   : > { %v1228_v18 = vpop.f32.mrb[10].mxu1 }
 0x32f   : > { %v1232_v13 = vmax.f32 %v1154_v16, %v1228_v18  ;;  %v1434_v19 = vpop.f32.mrb[11].mxu1 }
 0x331   : > { %1234 = vst.msk [vmem:[%s276_s11] sm:$0x1f] %vm1233_vm8, %v1232_v13 }
 0x332 PF: > { %s17_s24 = sadd.s32 1, %s1637_s24  }
 0x333   : > { %p14_p4 = scmp.ge.s32.totalorder %s17_s24, 4  }
 0x335   :  { %16 = sbr.rel (!%p14_p4) target bundleno = 1 (0x1), region = 82 }

</bundles_post_ra>
